<compile_context>
chip_gen: v7x
topology: tpu7x:2x2x1
jax: 0.10.0
libtpu: 0.0.40
codegen_flags: <defaults>
</compile_context>

<pallas_src>
import functools

import jax
import jax.numpy as jnp
from jax.experimental import pallas as pl
from jax.experimental.pallas import tpu as pltpu


# ----------------------------- kernel ---------------------------------------

def _layernorm(v, w, b, eps=1e-5):
    # v: (M, D) f32; w, b: (1, D) f32
    mu = jnp.mean(v, axis=-1, keepdims=True)
    var = jnp.mean((v - mu) ** 2, axis=-1, keepdims=True)
    return (v - mu) * jax.lax.rsqrt(var + eps) * w + b


def residual_attention_kernel(x_ref,
                              ln1_w_ref, ln1_b_ref,
                              wqkv_ref, bqkv_ref, wo_ref, bo_ref,
                              ln2_w_ref, ln2_b_ref,
                              wfc_ref, bfc_ref, wproj_ref, bproj_ref,
                              o_ref, *, n_head):
    S, Bt, D = x_ref.shape
    H = n_head
    hd = D // H
    cdt = wqkv_ref.dtype                        # MXU operand dtype (f32 / bf16)
    exact_f32 = jnp.dtype(cdt) == jnp.dtype(jnp.float32)

    # Fold (S, Bt) into one M dimension for the dense matmuls (leading-dim
    # merge: no relayout).
    x = x_ref[...].astype(jnp.float32).reshape(S * Bt, D)

    # ---------------- attention branch ----------------
    # NOTE: 1/sqrt(head_dim) is already folded into the Q rows of wqkv / bqkv
    # during one-time weight preparation, so there is no per-step scale mul.
    xn = _layernorm(x, ln1_w_ref[...], ln1_b_ref[...])
    qkv = jnp.dot(xn.astype(cdt), wqkv_ref[...],
                  preferred_element_type=jnp.float32) + bqkv_ref[...]   # (M, 3D)

    def heads(t):
        # Cast BEFORE the head-major relayout so the cross-sublane permute
        # moves half the bytes on the bf16 path.
        t = t.astype(cdt).reshape(S, Bt, H, hd)
        return jnp.transpose(t, (1, 2, 0, 3)).reshape(Bt * H, S, hd)

    qh = heads(qkv[:, 0 * D:1 * D])
    kh = heads(qkv[:, 1 * D:2 * D])
    vh = heads(qkv[:, 2 * D:3 * D])

    # scores: (Bt*H, S_q, S_k); attn_mask is None for this module.
    # TODO(synk): add additive attn_mask support if a mask is ever supplied.
    scores = jnp.einsum('bqd,bkd->bqk', qh, kh,
                        preferred_element_type=jnp.float32)
    scores = scores - jnp.max(scores, axis=-1, keepdims=True)
    p = jnp.exp(scores)
    denom = jnp.sum(p, axis=-1, keepdims=True)
    if exact_f32:
        p = p / denom                                  # tight f32 numerics
    else:
        p = p * pl.reciprocal(denom, approx=True)      # EUP slot, nearly free

    ctx = jnp.einsum('bqk,bkd->bqd', p.astype(cdt), vh,
                     preferred_element_type=jnp.float32)               # (Bt*H,S,hd)
    # Cast down before the inverse relayout; stay in cdt until the wo matmul.
    ctx = ctx.astype(cdt)
    ctx = jnp.transpose(ctx.reshape(Bt, H, S, hd), (2, 0, 1, 3)).reshape(S * Bt, D)

    attn_out = jnp.dot(ctx, wo_ref[...],
                       preferred_element_type=jnp.float32) + bo_ref[...]
    x = x + attn_out

    # ---------------- MLP branch ----------------
    xn2 = _layernorm(x, ln2_w_ref[...], ln2_b_ref[...])
    h = jnp.dot(xn2.astype(cdt), wfc_ref[...],
                preferred_element_type=jnp.float32) + bfc_ref[...]     # (M, 4D)
    h = h * jax.nn.sigmoid(1.702 * h)                                  # QuickGELU
    # TODO(synk): for very large d_model (bf16 D >= ~1536 / f32 D >= ~1024 on
    # v7x) add an "arbitrary" grid axis tiling the 4*D hidden dim of
    # wfc/wproj with an f32 VMEM accumulator; until then _pick_batch_tile
    # keeps the footprint in budget by shrinking the batch tile.
    m = jnp.dot(h.astype(cdt), wproj_ref[...],
                preferred_element_type=jnp.float32) + bproj_ref[...]   # (M, D)
    x = x + m

    o_ref[...] = x.reshape(S, Bt, D).astype(o_ref.dtype)


# ------------------ one-time weight preparation (per model) ------------------

def prepare_params(params, n_head, *, compute_dtype=jnp.bfloat16):
    """Transpose / cast / scale-fold the module's weights ONCE.

    Call this once per model (outside the forward hot path) and reuse the
    returned tuple for every residual_attention_block call.
    """
    f32 = jnp.float32
    D = params['wo'].shape[0]
    hd = D // n_head
    scale = 1.0 / float(hd) ** 0.5

    wqkv = jnp.asarray(params['wqkv'], f32)             # (3D, D), torch layout
    bqkv = jnp.asarray(params['bqkv'], f32)             # (3D,)
    row_scale = jnp.concatenate([jnp.full((D,), scale, f32),
                                 jnp.ones((2 * D,), f32)])
    wqkv = wqkv * row_scale[:, None]                    # fold 1/sqrt(hd) into Q
    bqkv = bqkv * row_scale

    return (
        jnp.asarray(params['ln1_w'], f32).reshape(1, D),
        jnp.asarray(params['ln1_b'], f32).reshape(1, D),
        wqkv.T.astype(compute_dtype),                               # (D, 3D)
        bqkv.reshape(1, 3 * D),
        jnp.asarray(params['wo'], f32).T.astype(compute_dtype),     # (D, D)
        jnp.asarray(params['bo'], f32).reshape(1, D),
        jnp.asarray(params['ln2_w'], f32).reshape(1, D),
        jnp.asarray(params['ln2_b'], f32).reshape(1, D),
        jnp.asarray(params['wfc'], f32).T.astype(compute_dtype),    # (D, 4D)
        jnp.asarray(params['bfc'], f32).reshape(1, 4 * D),
        jnp.asarray(params['wproj'], f32).T.astype(compute_dtype),  # (4D, D)
        jnp.asarray(params['bproj'], f32).reshape(1, D),
    )


# ----------------------- VMEM budget & tile selection ------------------------

def _vmem_budget_bytes():
    """Per-TensorCore VMEM budget: physical capacity minus headroom."""
    try:
        cap = int(pltpu.get_tpu_info().vmem_capacity_bytes)
    except Exception:
        cap = 64 << 20            # conservative: assume v7x-class 64 MiB / TC
    return max(min(cap - (8 << 20), 112 << 20), 16 << 20)


def _footprint_bytes(Bt, S, D, H, cdt_size):
    """Generous estimate of one grid step's VMEM footprint."""
    M = S * Bt
    w = 12 * D * D * cdt_size * 2 + 13 * D * 4 * 2      # double-buffered blocks
    io = 2 * (2 * M * D * 4)                             # x / out blocks
    act = (M * 3 * D * 4                                 # qkv (f32)
           + 3 * M * D * cdt_size                        # head-major q/k/v
           + 2 * Bt * H * S * S * 4                      # scores + probs
           + M * D * (4 + cdt_size)                      # ctx f32 + cdt copy
           + 4 * M * D * 4                               # xn / attn / resid / xn2
           + 2 * M * 4 * D * 4                           # mlp hidden + gelu
           + M * D * 4)                                  # mlp out
    return int(1.3 * (w + io + act))


def _pick_batch_tile(B, S, D, H, cdt_size, budget):
    """Largest VMEM-feasible batch tile; prefer >= 2 grid steps (so the
    "parallel" grid axis can shard over v7x's two TensorCores) and an
    M = S*Bt of at least 256 for MXU efficiency."""
    cands = [bt for bt in range(1, B + 1)
             if B % bt == 0 and (bt % 8 == 0 or bt == B)]
    feas = [bt for bt in cands
            if _footprint_bytes(bt, S, D, H, cdt_size) <= budget]
    if not feas:
        feas = [cands[0]]
    pref = [bt for bt in feas if B // bt >= 2 and bt * S >= 256]
    if pref:
        return max(pref)
    pref = [bt for bt in feas if B // bt >= 2]
    if pref:
        return max(pref)
    return max(feas)


# ----------------------------- wrapper ---------------------------------------

def residual_attention_block(x_sbd, prepared, n_head, *, batch_tile=None):
    """Fused ResidualAttentionBlock forward.

    x_sbd:    (S, B, D) float32, PyTorch MultiheadAttention (seq, batch, dim).
    prepared: output of prepare_params() (pre-transposed / cast weights).
    Returns a lazy (S, B, D) float32 array (caller blocks when needed).
    """
    S, B, D = x_sbd.shape
    cdt_size = jnp.dtype(prepared[2].dtype).itemsize

    budget = _vmem_budget_bytes()
    Bt = batch_tile if batch_tile is not None else _pick_batch_tile(
        B, S, D, n_head, cdt_size, budget)
    assert B % Bt == 0, "batch tile must divide batch"
    grid = (B // Bt,)

    vmem_limit = int(min(max(_footprint_bytes(Bt, S, D, n_head, cdt_size),
                             8 << 20), budget))

    x_spec = pl.BlockSpec((S, Bt, D), lambda b: (0, b, 0))
    out_spec = pl.BlockSpec((S, Bt, D), lambda b: (0, b, 0))
    # Weight blocks are constant across the grid -> Pallas DMAs them once.
    # TODO(synk): pipeline_mode=pl.Buffered(1) would halve their resident VMEM
    # on large d_model; default buffering kept for maximum compatibility and
    # the 2x footprint is accounted for in _footprint_bytes.
    w_specs = [pl.BlockSpec(a.shape, lambda b: (0, 0)) for a in prepared]

    return pl.pallas_call(
        functools.partial(residual_attention_kernel, n_head=n_head),
        out_shape=jax.ShapeDtypeStruct((S, B, D), jnp.float32),
        grid=grid,
        in_specs=[x_spec] + w_specs,
        out_specs=out_spec,
        compiler_params=pltpu.CompilerParams(
            dimension_semantics=("parallel",),       # shards across v7x's 2 TCs
            vmem_limit_bytes=vmem_limit),
    )(x_sbd, *prepared)


# ----------------------------- reference (plain JAX) -------------------------

def reference_block(x_sbd, params, n_head):
    S, B, D = x_sbd.shape
    hd = D // n_head
    scale = 1.0 / hd ** 0.5

    def ln(v, w, b, eps=1e-5):
        mu = jnp.mean(v, axis=-1, keepdims=True)
        var = jnp.mean((v - mu) ** 2, axis=-1, keepdims=True)
        return (v - mu) / jnp.sqrt(var + eps) * w + b

    def one(xb):                              # xb: (S, D), one batch element
        xn = ln(xb, params['ln1_w'], params['ln1_b'])
        qkv = xn @ params['wqkv'].T + params['bqkv']
        q, k, v = qkv[:, :D] * scale, qkv[:, D:2 * D], qkv[:, 2 * D:]
        qh = q.reshape(S, n_head, hd)
        kh = k.reshape(S, n_head, hd)
        vh = v.reshape(S, n_head, hd)
        s = jnp.einsum('qhd,khd->hqk', qh, kh)
        p = jax.nn.softmax(s, axis=-1)
        ctx = jnp.einsum('hqk,khd->qhd', p, vh).reshape(S, D)
        xb = xb + ctx @ params['wo'].T + params['bo']
        xn2 = ln(xb, params['ln2_w'], params['ln2_b'])
        h = xn2 @ params['wfc'].T + params['bfc']
        h = h * jax.nn.sigmoid(1.702 * h)
        return xb + h @ params['wproj'].T + params['bproj']

    return jax.vmap(one, in_axes=1, out_axes=1)(x_sbd)


# ----------------------------- main ------------------------------------------

if __name__ == "__main__":
    S, B, D, H = 8, 2, 32, 4                  # seq, batch, d_model, n_head

    key = jax.random.PRNGKey(0)
    ks = jax.random.split(key, 16)

    def nrm(k, shape, s=0.02):
        return (s * jax.random.normal(k, shape)).astype(jnp.float32)

    params = {
        'ln1_w':  (1.0 + nrm(ks[0], (D,), 0.1)),
        'ln1_b':  nrm(ks[1], (D,), 0.1),
        'wqkv':   nrm(ks[2], (3 * D, D)),      # attn.in_proj_weight
        'bqkv':   nrm(ks[3], (3 * D,)),        # attn.in_proj_bias
        'wo':     nrm(ks[4], (D, D)),          # attn.out_proj.weight
        'bo':     nrm(ks[5], (D,)),            # attn.out_proj.bias
        'ln2_w':  (1.0 + nrm(ks[6], (D,), 0.1)),
        'ln2_b':  nrm(ks[7], (D,), 0.1),
        'wfc':    nrm(ks[8], (4 * D, D)),      # mlp.c_fc.weight
        'bfc':    nrm(ks[9], (4 * D,)),        # mlp.c_fc.bias
        'wproj':  nrm(ks[10], (D, 4 * D)),     # mlp.c_proj.weight
        'bproj':  nrm(ks[11], (D,)),           # mlp.c_proj.bias
    }

    x = jax.random.normal(ks[12], (S, B, D), dtype=jnp.float32)
    ref = reference_block(x, params, n_head=H)

    # f32 MXU operands (tight numerics check).
    prep_f32 = prepare_params(params, n_head=H, compute_dtype=jnp.float32)
    out_f32 = jax.block_until_ready(
        residual_attention_block(x, prep_f32, n_head=H))
    assert out_f32.shape == (S, B, D)
    assert jnp.allclose(out_f32, ref, atol=1e-3, rtol=1e-3), (
        float(jnp.max(jnp.abs(out_f32 - ref))))

    # bf16 MXU operands (production path for v5e/v6e/v7x), looser check.
    prep_bf16 = prepare_params(params, n_head=H, compute_dtype=jnp.bfloat16)
    out_bf16 = jax.block_until_ready(
        residual_attention_block(x, prep_bf16, n_head=H))
    assert jnp.allclose(out_bf16, ref, atol=2e-2, rtol=2e-2), (
        float(jnp.max(jnp.abs(out_bf16 - ref))))

    print("KERNEL_OK")
</pallas_src>

<mosaic_0001>
module attributes {stable_mosaic.version = 11 : i64} {
  func.func @residual_attention_kernel(%arg0: i32, %arg1: memref<8x2x32xf32, #tpu.memory_space<vmem>>, %arg2: memref<1x32xf32, #tpu.memory_space<vmem>>, %arg3: memref<1x32xf32, #tpu.memory_space<vmem>>, %arg4: memref<32x96xf32, #tpu.memory_space<vmem>>, %arg5: memref<1x96xf32, #tpu.memory_space<vmem>>, %arg6: memref<32x32xf32, #tpu.memory_space<vmem>>, %arg7: memref<1x32xf32, #tpu.memory_space<vmem>>, %arg8: memref<1x32xf32, #tpu.memory_space<vmem>>, %arg9: memref<1x32xf32, #tpu.memory_space<vmem>>, %arg10: memref<32x128xf32, #tpu.memory_space<vmem>>, %arg11: memref<1x128xf32, #tpu.memory_space<vmem>>, %arg12: memref<128x32xf32, #tpu.memory_space<vmem>>, %arg13: memref<1x32xf32, #tpu.memory_space<vmem>>, %arg14: memref<8x2x32xf32, #tpu.memory_space<vmem>>) attributes {dimension_semantics = [#tpu.dimension_semantics<parallel>], iteration_bounds = array<i64: 1>, scalar_prefetch = 0 : i64, scratch_operands = 0 : i64, tpu.core_type = #tpu.core_type<tc>, window_params = [{transform_indices = @transform_0, window_bounds = array<i64: 8, 2, 32>}, {pipeline_mode = #tpu.pipeline_mode<synchronous>, transform_indices = @transform_1, window_bounds = array<i64: 1, 32>}, {pipeline_mode = #tpu.pipeline_mode<synchronous>, transform_indices = @transform_2, window_bounds = array<i64: 1, 32>}, {pipeline_mode = #tpu.pipeline_mode<synchronous>, transform_indices = @transform_3, window_bounds = array<i64: 32, 96>}, {pipeline_mode = #tpu.pipeline_mode<synchronous>, transform_indices = @transform_4, window_bounds = array<i64: 1, 96>}, {pipeline_mode = #tpu.pipeline_mode<synchronous>, transform_indices = @transform_5, window_bounds = array<i64: 32, 32>}, {pipeline_mode = #tpu.pipeline_mode<synchronous>, transform_indices = @transform_6, window_bounds = array<i64: 1, 32>}, {pipeline_mode = #tpu.pipeline_mode<synchronous>, transform_indices = @transform_7, window_bounds = array<i64: 1, 32>}, {pipeline_mode = #tpu.pipeline_mode<synchronous>, transform_indices = @transform_8, window_bounds = array<i64: 1, 32>}, {pipeline_mode = #tpu.pipeline_mode<synchronous>, transform_indices = @transform_9, window_bounds = array<i64: 32, 128>}, {pipeline_mode = #tpu.pipeline_mode<synchronous>, transform_indices = @transform_10, window_bounds = array<i64: 1, 128>}, {pipeline_mode = #tpu.pipeline_mode<synchronous>, transform_indices = @transform_11, window_bounds = array<i64: 128, 32>}, {pipeline_mode = #tpu.pipeline_mode<synchronous>, transform_indices = @transform_12, window_bounds = array<i64: 1, 32>}, {transform_indices = @transform_13, window_bounds = array<i64: 8, 2, 32>}]} {
    %c0 = arith.constant 0 : index
    %c0_0 = arith.constant 0 : index
    %c0_1 = arith.constant 0 : index
    %0 = vector.load %arg1[%c0, %c0_0, %c0_1] : memref<8x2x32xf32, #tpu.memory_space<vmem>>, vector<8x2x32xf32>
    %1 = vector.shape_cast %0 : vector<8x2x32xf32> to vector<16x32xf32>
    %c0_2 = arith.constant 0 : index
    %c0_3 = arith.constant 0 : index
    %2 = vector.load %arg2[%c0_2, %c0_3] : memref<1x32xf32, #tpu.memory_space<vmem>>, vector<1x32xf32>
    %c0_4 = arith.constant 0 : index
    %c0_5 = arith.constant 0 : index
    %3 = vector.load %arg3[%c0_4, %c0_5] : memref<1x32xf32, #tpu.memory_space<vmem>>, vector<1x32xf32>
    %cst = arith.constant dense<0.000000e+00> : vector<16xf32>
    %4 = vector.multi_reduction <add>, %1, %cst [1] : vector<16x32xf32> to vector<16xf32>
    %5 = vector.shape_cast %4 : vector<16xf32> to vector<16x1xf32>
    %cst_6 = arith.constant 3.200000e+01 : f32
    %6 = vector.broadcast %cst_6 : f32 to vector<16x1xf32>
    %7 = arith.divf %5, %6 : vector<16x1xf32>
    %8 = vector.broadcast %7 : vector<16x1xf32> to vector<16x32xf32>
    %9 = arith.subf %1, %8 : vector<16x32xf32>
    %10 = arith.mulf %9, %9 : vector<16x32xf32>
    %cst_7 = arith.constant dense<0.000000e+00> : vector<16xf32>
    %11 = vector.multi_reduction <add>, %10, %cst_7 [1] : vector<16x32xf32> to vector<16xf32>
    %12 = vector.shape_cast %11 : vector<16xf32> to vector<16x1xf32>
    %cst_8 = arith.constant 3.200000e+01 : f32
    %13 = vector.broadcast %cst_8 : f32 to vector<16x1xf32>
    %14 = arith.divf %12, %13 : vector<16x1xf32>
    %15 = vector.broadcast %7 : vector<16x1xf32> to vector<16x32xf32>
    %16 = arith.subf %1, %15 : vector<16x32xf32>
    %cst_9 = arith.constant 9.99999974E-6 : f32
    %17 = vector.broadcast %cst_9 : f32 to vector<16x1xf32>
    %18 = arith.addf %14, %17 : vector<16x1xf32>
    %19 = math.rsqrt %18 : vector<16x1xf32>
    %20 = vector.broadcast %19 : vector<16x1xf32> to vector<16x32xf32>
    %21 = arith.mulf %16, %20 : vector<16x32xf32>
    %22 = vector.broadcast %2 : vector<1x32xf32> to vector<16x32xf32>
    %23 = arith.mulf %21, %22 : vector<16x32xf32>
    %24 = vector.broadcast %3 : vector<1x32xf32> to vector<16x32xf32>
    %25 = arith.addf %23, %24 : vector<16x32xf32>
    %c0_10 = arith.constant 0 : index
    %c0_11 = arith.constant 0 : index
    %26 = vector.load %arg4[%c0_10, %c0_11] : memref<32x96xf32, #tpu.memory_space<vmem>>, vector<32x96xf32>
    %cst_12 = arith.constant dense<0.000000e+00> : vector<16x96xf32>
    %27 = tpu.matmul %25, %26, %cst_12 {dimension_numbers = #tpu.dot_dimension_numbers<[1], [0], [0], [1], [0, 0, 1, 1], [], []>} : vector<16x32xf32>, vector<32x96xf32>, vector<16x96xf32> -> vector<16x96xf32>
    %c0_13 = arith.constant 0 : index
    %c0_14 = arith.constant 0 : index
    %28 = vector.load %arg5[%c0_13, %c0_14] : memref<1x96xf32, #tpu.memory_space<vmem>>, vector<1x96xf32>
    %29 = vector.broadcast %28 : vector<1x96xf32> to vector<16x96xf32>
    %30 = arith.addf %27, %29 : vector<16x96xf32>
    %31 = vector.extract_strided_slice %30 {offsets = [0, 0], sizes = [16, 32], strides = [1, 1]} : vector<16x96xf32> to vector<16x32xf32>
    %32 = vector.shape_cast %31 : vector<16x32xf32> to vector<8x2x4x8xf32>
    %33 = tpu.transpose %32, [1, 2, 0, 3] : vector<8x2x4x8xf32> -> vector<2x4x8x8xf32>
    %34 = vector.shape_cast %33 : vector<2x4x8x8xf32> to vector<8x8x8xf32>
    %35 = vector.extract_strided_slice %30 {offsets = [0, 32], sizes = [16, 32], strides = [1, 1]} : vector<16x96xf32> to vector<16x32xf32>
    %36 = vector.shape_cast %35 : vector<16x32xf32> to vector<8x2x4x8xf32>
    %37 = tpu.transpose %36, [1, 2, 0, 3] : vector<8x2x4x8xf32> -> vector<2x4x8x8xf32>
    %38 = vector.shape_cast %37 : vector<2x4x8x8xf32> to vector<8x8x8xf32>
    %39 = vector.extract_strided_slice %30 {offsets = [0, 64], sizes = [16, 32], strides = [1, 1]} : vector<16x96xf32> to vector<16x32xf32>
    %40 = vector.shape_cast %39 : vector<16x32xf32> to vector<8x2x4x8xf32>
    %41 = tpu.transpose %40, [1, 2, 0, 3] : vector<8x2x4x8xf32> -> vector<2x4x8x8xf32>
    %42 = vector.shape_cast %41 : vector<2x4x8x8xf32> to vector<8x8x8xf32>
    "tpu.trace_start"() <{level = 10 : i32, message = "bqd,bkd->bqk"}> : () -> ()
    %cst_15 = arith.constant dense<0.000000e+00> : vector<8x8x8xf32>
    %43 = tpu.matmul %34, %38, %cst_15 {dimension_numbers = #tpu.dot_dimension_numbers<[2], [2], [1], [1], [0, 0, 0, 1, 1, 1], [0], [0]>} : vector<8x8x8xf32>, vector<8x8x8xf32>, vector<8x8x8xf32> -> vector<8x8x8xf32>
    "tpu.trace_stop"() : () -> ()
    %cst_16 = arith.constant dense<0xFF800000> : vector<8x8xf32>
    %44 = vector.multi_reduction <maximumf>, %43, %cst_16 [2] : vector<8x8x8xf32> to vector<8x8xf32>
    %45 = vector.shape_cast %44 : vector<8x8xf32> to vector<8x8x1xf32>
    %46 = vector.broadcast %45 : vector<8x8x1xf32> to vector<8x8x8xf32>
    %47 = arith.subf %43, %46 : vector<8x8x8xf32>
    %48 = math.exp %47 : vector<8x8x8xf32>
    %cst_17 = arith.constant dense<0.000000e+00> : vector<8x8xf32>
    %49 = vector.multi_reduction <add>, %48, %cst_17 [2] : vector<8x8x8xf32> to vector<8x8xf32>
    %50 = vector.shape_cast %49 : vector<8x8xf32> to vector<8x8x1xf32>
    %51 = vector.broadcast %50 : vector<8x8x1xf32> to vector<8x8x8xf32>
    %52 = arith.divf %48, %51 : vector<8x8x8xf32>
    "tpu.trace_start"() <{level = 10 : i32, message = "bqk,bkd->bqd"}> : () -> ()
    %cst_18 = arith.constant dense<0.000000e+00> : vector<8x8x8xf32>
    %53 = tpu.matmul %52, %42, %cst_18 {dimension_numbers = #tpu.dot_dimension_numbers<[2], [1], [1], [2], [0, 0, 0, 1, 1, 2], [0], [0]>} : vector<8x8x8xf32>, vector<8x8x8xf32>, vector<8x8x8xf32> -> vector<8x8x8xf32>
    "tpu.trace_stop"() : () -> ()
    %54 = vector.shape_cast %53 : vector<8x8x8xf32> to vector<2x4x8x8xf32>
    %55 = tpu.transpose %54, [2, 0, 1, 3] : vector<2x4x8x8xf32> -> vector<8x2x4x8xf32>
    %56 = vector.shape_cast %55 : vector<8x2x4x8xf32> to vector<16x32xf32>
    %c0_19 = arith.constant 0 : index
    %c0_20 = arith.constant 0 : index
    %57 = vector.load %arg6[%c0_19, %c0_20] : memref<32x32xf32, #tpu.memory_space<vmem>>, vector<32x32xf32>
    %cst_21 = arith.constant dense<0.000000e+00> : vector<16x32xf32>
    %58 = tpu.matmul %56, %57, %cst_21 {dimension_numbers = #tpu.dot_dimension_numbers<[1], [0], [0], [1], [0, 0, 1, 1], [], []>} : vector<16x32xf32>, vector<32x32xf32>, vector<16x32xf32> -> vector<16x32xf32>
    %c0_22 = arith.constant 0 : index
    %c0_23 = arith.constant 0 : index
    %59 = vector.load %arg7[%c0_22, %c0_23] : memref<1x32xf32, #tpu.memory_space<vmem>>, vector<1x32xf32>
    %60 = vector.broadcast %59 : vector<1x32xf32> to vector<16x32xf32>
    %61 = arith.addf %58, %60 : vector<16x32xf32>
    %62 = arith.addf %1, %61 : vector<16x32xf32>
    %c0_24 = arith.constant 0 : index
    %c0_25 = arith.constant 0 : index
    %63 = vector.load %arg8[%c0_24, %c0_25] : memref<1x32xf32, #tpu.memory_space<vmem>>, vector<1x32xf32>
    %c0_26 = arith.constant 0 : index
    %c0_27 = arith.constant 0 : index
    %64 = vector.load %arg9[%c0_26, %c0_27] : memref<1x32xf32, #tpu.memory_space<vmem>>, vector<1x32xf32>
    %cst_28 = arith.constant dense<0.000000e+00> : vector<16xf32>
    %65 = vector.multi_reduction <add>, %62, %cst_28 [1] : vector<16x32xf32> to vector<16xf32>
    %66 = vector.shape_cast %65 : vector<16xf32> to vector<16x1xf32>
    %cst_29 = arith.constant 3.200000e+01 : f32
    %67 = vector.broadcast %cst_29 : f32 to vector<16x1xf32>
    %68 = arith.divf %66, %67 : vector<16x1xf32>
    %69 = vector.broadcast %68 : vector<16x1xf32> to vector<16x32xf32>
    %70 = arith.subf %62, %69 : vector<16x32xf32>
    %71 = arith.mulf %70, %70 : vector<16x32xf32>
    %cst_30 = arith.constant dense<0.000000e+00> : vector<16xf32>
    %72 = vector.multi_reduction <add>, %71, %cst_30 [1] : vector<16x32xf32> to vector<16xf32>
    %73 = vector.shape_cast %72 : vector<16xf32> to vector<16x1xf32>
    %cst_31 = arith.constant 3.200000e+01 : f32
    %74 = vector.broadcast %cst_31 : f32 to vector<16x1xf32>
    %75 = arith.divf %73, %74 : vector<16x1xf32>
    %76 = vector.broadcast %68 : vector<16x1xf32> to vector<16x32xf32>
    %77 = arith.subf %62, %76 : vector<16x32xf32>
    %cst_32 = arith.constant 9.99999974E-6 : f32
    %78 = vector.broadcast %cst_32 : f32 to vector<16x1xf32>
    %79 = arith.addf %75, %78 : vector<16x1xf32>
    %80 = math.rsqrt %79 : vector<16x1xf32>
    %81 = vector.broadcast %80 : vector<16x1xf32> to vector<16x32xf32>
    %82 = arith.mulf %77, %81 : vector<16x32xf32>
    %83 = vector.broadcast %63 : vector<1x32xf32> to vector<16x32xf32>
    %84 = arith.mulf %82, %83 : vector<16x32xf32>
    %85 = vector.broadcast %64 : vector<1x32xf32> to vector<16x32xf32>
    %86 = arith.addf %84, %85 : vector<16x32xf32>
    %c0_33 = arith.constant 0 : index
    %c0_34 = arith.constant 0 : index
    %87 = vector.load %arg10[%c0_33, %c0_34] : memref<32x128xf32, #tpu.memory_space<vmem>>, vector<32x128xf32>
    %cst_35 = arith.constant dense<0.000000e+00> : vector<16x128xf32>
    %88 = tpu.matmul %86, %87, %cst_35 {dimension_numbers = #tpu.dot_dimension_numbers<[1], [0], [0], [1], [0, 0, 1, 1], [], []>} : vector<16x32xf32>, vector<32x128xf32>, vector<16x128xf32> -> vector<16x128xf32>
    %c0_36 = arith.constant 0 : index
    %c0_37 = arith.constant 0 : index
    %89 = vector.load %arg11[%c0_36, %c0_37] : memref<1x128xf32, #tpu.memory_space<vmem>>, vector<1x128xf32>
    %90 = vector.broadcast %89 : vector<1x128xf32> to vector<16x128xf32>
    %91 = arith.addf %88, %90 : vector<16x128xf32>
    %cst_38 = arith.constant 1.702000e+00 : f32
    %92 = vector.broadcast %cst_38 : f32 to vector<16x128xf32>
    %93 = arith.mulf %92, %91 : vector<16x128xf32>
    %94 = arith.negf %93 : vector<16x128xf32>
    %95 = math.exp %94 : vector<16x128xf32>
    %cst_39 = arith.constant 1.000000e+00 : f32
    %96 = vector.broadcast %cst_39 : f32 to vector<16x128xf32>
    %97 = arith.addf %96, %95 : vector<16x128xf32>
    %98 = arith.divf %96, %97 : vector<16x128xf32>
    %99 = arith.mulf %91, %98 : vector<16x128xf32>
    %c0_40 = arith.constant 0 : index
    %c0_41 = arith.constant 0 : index
    %100 = vector.load %arg12[%c0_40, %c0_41] : memref<128x32xf32, #tpu.memory_space<vmem>>, vector<128x32xf32>
    %cst_42 = arith.constant dense<0.000000e+00> : vector<16x32xf32>
    %101 = tpu.matmul %99, %100, %cst_42 {dimension_numbers = #tpu.dot_dimension_numbers<[1], [0], [0], [1], [0, 0, 1, 1], [], []>} : vector<16x128xf32>, vector<128x32xf32>, vector<16x32xf32> -> vector<16x32xf32>
    %c0_43 = arith.constant 0 : index
    %c0_44 = arith.constant 0 : index
    %102 = vector.load %arg13[%c0_43, %c0_44] : memref<1x32xf32, #tpu.memory_space<vmem>>, vector<1x32xf32>
    %103 = vector.broadcast %102 : vector<1x32xf32> to vector<16x32xf32>
    %104 = arith.addf %101, %103 : vector<16x32xf32>
    %105 = arith.addf %62, %104 : vector<16x32xf32>
    %106 = vector.shape_cast %105 : vector<16x32xf32> to vector<8x2x32xf32>
    %c0_45 = arith.constant 0 : index
    %c0_46 = arith.constant 0 : index
    %c0_47 = arith.constant 0 : index
    %107 = vector.load %arg14[%c0_45, %c0_46, %c0_47] : memref<8x2x32xf32, #tpu.memory_space<vmem>>, vector<8x2x32xf32>
    tpu.vector_store %arg14[%c0_45, %c0_46, %c0_47], %106 {strides = array<i32>} : memref<8x2x32xf32, #tpu.memory_space<vmem>>, vector<8x2x32xf32>,
    return
  }
  func.func @transform_0(%arg0: i32) -> (i32, i32, i32) {
    %c0_i32 = arith.constant 0 : i32
    %c0_i32_0 = arith.constant 0 : i32
    %c0_i32_1 = arith.constant 0 : i32
    return %c0_i32, %arg0, %c0_i32_0 : i32, i32, i32
  }
  func.func @transform_1(%arg0: i32) -> (i32, i32) {
    %c0_i32 = arith.constant 0 : i32
    %c0_i32_0 = arith.constant 0 : i32
    %c0_i32_1 = arith.constant 0 : i32
    return %c0_i32, %c0_i32_0 : i32, i32
  }
  func.func @transform_2(%arg0: i32) -> (i32, i32) {
    %c0_i32 = arith.constant 0 : i32
    %c0_i32_0 = arith.constant 0 : i32
    %c0_i32_1 = arith.constant 0 : i32
    return %c0_i32, %c0_i32_0 : i32, i32
  }
  func.func @transform_3(%arg0: i32) -> (i32, i32) {
    %c0_i32 = arith.constant 0 : i32
    %c0_i32_0 = arith.constant 0 : i32
    %c0_i32_1 = arith.constant 0 : i32
    return %c0_i32, %c0_i32_0 : i32, i32
  }
  func.func @transform_4(%arg0: i32) -> (i32, i32) {
    %c0_i32 = arith.constant 0 : i32
    %c0_i32_0 = arith.constant 0 : i32
    %c0_i32_1 = arith.constant 0 : i32
    return %c0_i32, %c0_i32_0 : i32, i32
  }
  func.func @transform_5(%arg0: i32) -> (i32, i32) {
    %c0_i32 = arith.constant 0 : i32
    %c0_i32_0 = arith.constant 0 : i32
    %c0_i32_1 = arith.constant 0 : i32
    return %c0_i32, %c0_i32_0 : i32, i32
  }
  func.func @transform_6(%arg0: i32) -> (i32, i32) {
    %c0_i32 = arith.constant 0 : i32
    %c0_i32_0 = arith.constant 0 : i32
    %c0_i32_1 = arith.constant 0 : i32
    return %c0_i32, %c0_i32_0 : i32, i32
  }
  func.func @transform_7(%arg0: i32) -> (i32, i32) {
    %c0_i32 = arith.constant 0 : i32
    %c0_i32_0 = arith.constant 0 : i32
    %c0_i32_1 = arith.constant 0 : i32
    return %c0_i32, %c0_i32_0 : i32, i32
  }
  func.func @transform_8(%arg0: i32) -> (i32, i32) {
    %c0_i32 = arith.constant 0 : i32
    %c0_i32_0 = arith.constant 0 : i32
    %c0_i32_1 = arith.constant 0 : i32
    return %c0_i32, %c0_i32_0 : i32, i32
  }
  func.func @transform_9(%arg0: i32) -> (i32, i32) {
    %c0_i32 = arith.constant 0 : i32
    %c0_i32_0 = arith.constant 0 : i32
    %c0_i32_1 = arith.constant 0 : i32
    return %c0_i32, %c0_i32_0 : i32, i32
  }
  func.func @transform_10(%arg0: i32) -> (i32, i32) {
    %c0_i32 = arith.constant 0 : i32
    %c0_i32_0 = arith.constant 0 : i32
    %c0_i32_1 = arith.constant 0 : i32
    return %c0_i32, %c0_i32_0 : i32, i32
  }
  func.func @transform_11(%arg0: i32) -> (i32, i32) {
    %c0_i32 = arith.constant 0 : i32
    %c0_i32_0 = arith.constant 0 : i32
    %c0_i32_1 = arith.constant 0 : i32
    return %c0_i32, %c0_i32_0 : i32, i32
  }
  func.func @transform_12(%arg0: i32) -> (i32, i32) {
    %c0_i32 = arith.constant 0 : i32
    %c0_i32_0 = arith.constant 0 : i32
    %c0_i32_1 = arith.constant 0 : i32
    return %c0_i32, %c0_i32_0 : i32, i32
  }
  func.func @transform_13(%arg0: i32) -> (i32, i32, i32) {
    %c0_i32 = arith.constant 0 : i32
    %c0_i32_0 = arith.constant 0 : i32
    %c0_i32_1 = arith.constant 0 : i32
    return %c0_i32, %arg0, %c0_i32_0 : i32, i32, i32
  }
}

</mosaic_0001>

<bundles_post_ra>
// kernel: tpu_custom_call.1
= control target key start
LH: loop header
LB: loop body
LE: loop exit
PB: predicated region body
PF: predicated region fallthrough
CT: control target
= control target key end

     0   :  { %v68_v2 = vlaneseq  ;;  %v4214_v5 = vmov 1983009808   ;;  %s5033_s0 = inlined_call_operand.vmem [shape: f32[8,2,32], index: 0, kind: input, shape index: {}]   ;;  %s5034_s1 = inlined_call_operand.vmem [shape: f32[1,32], index: 1, kind: input, shape index: {}]   ;;  %s5035_s2 = inlined_call_operand.vmem [shape: f32[1,32], index: 2, kind: input, shape index: {}]   ;;  %s5036_s3 = inlined_call_operand.vmem [shape: f32[32,96], index: 3, kind: input, shape index: {}]   ;;  %s5037_s4 = inlined_call_operand.vmem [shape: f32[1,96], index: 4, kind: input, shape index: {}]   ;;  %s5038_s5 = inlined_call_operand.vmem [shape: f32[32,32], index: 5, kind: input, shape index: {}]   ;;  %s5039_s6 = inlined_call_operand.vmem [shape: f32[1,32], index: 6, kind: input, shape index: {}]   ;;  %s5040_s7 = inlined_call_operand.vmem [shape: f32[1,32], index: 7, kind: input, shape index: {}]   ;;  %s5041_s8 = inlined_call_operand.vmem [shape: f32[1,32], index: 8, kind: input, shape index: {}]   ;;  %s5042_s9 = inlined_call_operand.vmem [shape: f32[32,128], index: 9, kind: input, shape index: {}]   ;;  %s5043_s10 = inlined_call_operand.vmem [shape: f32[1,128], index: 10, kind: input, shape index: {}]   ;;  %s5044_s11 = inlined_call_operand.vmem [shape: f32[128,32], index: 11, kind: input, shape index: {}]   ;;  %s5045_s12 = inlined_call_operand.vmem [shape: f32[1,32], index: 12, kind: input, shape index: {}]   ;;  %s5046_s13 = inlined_call_operand.hbm [shape: f32[8,2,32], index: 13, kind: output, shape index: {}]  }
   0x1   :  { %v45_v0 = vld [vmem:[%s5033_s0] sm:$0x3]  ;;  %v46_v1 = vld [vmem:[%s5033_s0 + $0x2] sm:$0x3]  ;;  %v47_v3 = vld [vmem:[%s5033_s0 + $0x4] sm:$0x3]  ;;  %v66_v6 = vunpack.c.l.s4 %v4214_v5 }
   0x2   :  { %v48_v4 = vld [vmem:[%s5033_s0 + $0x6] sm:$0x3]  ;;  %v4315_v7 = vshrl.u32 %v68_v2, 7  ;;  %v49_v8 = vld [vmem:[%s5033_s0 + $0x8] sm:$0x3]  ;;  %v63_v10 = vcombine.low %v45_v0, %v46_v1 }
   0x3   :  { %v50_v9 = vld [vmem:[%s5033_s0 + $0xa] sm:$0x3]  ;;  %v51_v11 = vld [vmem:[%s5033_s0 + $0xc] sm:$0x3]  ;;  %v52_v12 = vld [vmem:[%s5033_s0 + $0xe] sm:$0x3]  ;;  %v64_v13 = vcombine.low %v47_v3, %v48_v4  ;;  %v67_v14 = vunpack.c.0.s8 %v66_v6 }
   0x4   :  { %v80_v15 = vcombine.low %v49_v8, %v50_v9  ;;  %v81_v16 = vcombine.low %v51_v11, %v52_v12 }
   0x5   :  { %18 = vsyncpa [#allocation3], 0  ;;  %v4330_v17 = vsub.s32 %v67_v14, %v4315_v7  ;;  %vm99_vm0 = vcmask 261120   ;;  %v4215_v26 = vmov 269488144   ;;  %s4220_s19 = smov 112  }
   0x6   :  { %v112_v27 = vunpack.c.l.s4 %v4215_v26  ;;  %v4216_v28 = vmov 842150450   ;;  %v4217_v30 = vmov 1414812756   ;;  %v4218_v32 = vmov 1987475062  }
   0x7   :  { %v71_v18 = vrot.slane %v63_v10, %v4330_v17  ;;  %v78_v19 = vrot.slane %v64_v13, %v4330_v17  ;;  %v88_v20 = vrot.slane %v80_v15, %v4330_v17  ;;  %v95_v21 = vrot.slane %v81_v16, %v4330_v17  ;;  %s4221_s20 = smov 104   ;;  %s4226_s21 = smov 64  }
   0x8   :  { %v119_v29 = vunpack.c.l.s4 %v4216_v28  ;;  %v126_v31 = vunpack.c.l.s4 %v4217_v30  ;;  %v133_v33 = vunpack.c.l.s4 %v4218_v32  ;;  %v113_v34 = vunpack.c.0.s8 %v112_v27  ;;  %s4227_s30 = smov 8   ;;  %s4228_s14 = smov 16  }
   0x9   :  { %v79_v22 = vcombine.low %v71_v18, %v78_v19  ;;  %v96_v23 = vcombine.low %v88_v20, %v95_v21  ;;  %v389_v20 = vld [vmem:[%s5036_s3] sm:$0xff]  ;;  %v390_v21 = vld [vmem:[%s5036_s3 + $0x8] sm:$0xff]  ;;  %vm4224_vm1 = vmmov 0   ;;  %vm1405_vm2 = vcmask 64512   ;;  %s4229_s15 = smov 24  }
   0xa   :  { %v120_v35 = vunpack.c.0.s8 %v119_v29  ;;  %v127_v36 = vunpack.c.0.s8 %v126_v31  ;;  %v134_v37 = vunpack.c.0.s8 %v133_v33  ;;  %v4339_v38 = vsub.s32 %v113_v34, %v4315_v7  ;;  %v3791_v31 = vld [vmem:[%s5034_s1] ss:$0 sm:$0xff] }
   0xb   :  { %v100_v24 = vsel %vm99_vm0, %v79_v22, 0.0  ;;  %v103_v25 = vsel %vm99_vm0, %v96_v23, 0.0  ;;  %v391_v22 = vld [vmem:[%s5036_s3 + $0x10] sm:$0xff]  ;;  %v4059_v23 = vpack.c.bf16 %v390_v21, %v389_v20  ;;  %v3792_v33 = vld [vmem:[%s5035_s2] ss:$0 sm:$0xff]  ;;  %v326_v34 = vcombine.high %v3791_v31, %v3791_v31 }
   0xc   :  { %101 = vadd.xlane.f32.xlu0 %v100_v24  ;;  %v4342_v39 = vsub.s32 %v120_v35, %v4315_v7  ;;  %v4345_v40 = vsub.s32 %v127_v36, %v4315_v7  ;;  %v4348_v41 = vsub.s32 %v134_v37, %v4315_v7  ;;  %v392_v24 = vld [vmem:[%s5036_s3 + $0x18] sm:$0xff]  ;;  %v333_v35 = vrot.slane %v3791_v31, %v4330_v17  ;;  %s4219_s3 = smov 120  }
   0xd   :  { %4060 = vmatprep.subr.bf16.mxu1 %v4059_v23  ;;  %v360_v36 = vcombine.high %v3792_v33, %v3792_v33  ;;  %v340_v37 = vrot.slane %v326_v34, %v4330_v17  ;;  %vm2984_vm3 = vcmask 130048   ;;  %vm2987_vm4 = vcmask 195584  }
   0xe   :  { %4062 = vmatpush3.bf16.msra.mxu1 %v4059_v23  ;;  %vm3766_vm5 = vcmask 254976  }
  0x10   :  { %104 = vadd.xlane.f32.xlu0 %v103_v25  ;;  %v4063_v25 = vpack.c.bf16 %v392_v24, %v391_v22 }
  0x12   :  { %4064 = vmatprep.subr.bf16.mxu1 %v4063_v25 }
  0x13   :  { %4066 = vmatpush3.bf16.msra.mxu1 %v4063_v25 }
  0x99   :  { %v102_v42 = vpop.xlane.xlu0 %101 }
  0x9a   :  { %v107_v43 = vmul.f32 0.03125, %v102_v42  ;;  %v367_v42 = vrot.slane %v3792_v33, %v4330_v17 }
  0x9c   :  { %v117_v44 = vrot.slane %v107_v43, %v4339_v38  ;;  %v124_v45 = vrot.slane %v107_v43, %v4342_v39  ;;  %v131_v46 = vrot.slane %v107_v43, %v4345_v40  ;;  %v138_v47 = vrot.slane %v107_v43, %v4348_v41 }
  0x9d   :  { %v105_v48 = vpop.xlane.xlu0 %104 }
  0x9e   :  { %v108_v49 = vmul.f32 0.03125, %v105_v48  ;;  %v4354_v50 = vsub.f32 %v45_v0, %v117_v44  ;;  %v4356_v51 = vsub.f32 %v46_v1, %v124_v45  ;;  %v4358_v52 = vsub.f32 %v47_v3, %v131_v46 }
  0x9f   :  { %v4360_v53 = vsub.f32 %v48_v4, %v138_v47  ;;  %v341_v44 = vcombine.high %v333_v35, %v333_v35  ;;  %v374_v45 = vrot.slane %v360_v36, %v4330_v17 }
  0xa0   :  { %v145_v54 = vrot.slane %v108_v49, %v4339_v38  ;;  %v152_v55 = vrot.slane %v108_v49, %v4342_v39  ;;  %v159_v56 = vrot.slane %v108_v49, %v4345_v40  ;;  %v166_v57 = vrot.slane %v108_v49, %v4348_v41 }
  0xa1   :  { %v183_v58 = vmul.f32 %v4354_v50, %v4354_v50  ;;  %v184_v59 = vmul.f32 %v4356_v51, %v4356_v51  ;;  %v185_v60 = vmul.f32 %v4358_v52, %v4358_v52  ;;  %v186_v61 = vmul.f32 %v4360_v53, %v4360_v53 }
  0xa2   :  { %v4374_v62 = vsub.f32 %v49_v8, %v145_v54  ;;  %v4376_v63 = vsub.f32 %v50_v9, %v152_v55  ;;  %v4378_v0 = vsub.f32 %v51_v11, %v159_v56  ;;  %v4380_v1 = vsub.f32 %v52_v12, %v166_v57 }
  0xa3   :  { %v199_v2 = vcombine.low %v183_v58, %v184_v59  ;;  %v200_v3 = vcombine.low %v185_v60, %v186_v61  ;;  %v342_v54 = vcombine.high %v340_v37, %v340_v37  ;;  %v375_v55 = vcombine.high %v367_v42, %v367_v42 }
  0xa4   :  { %v187_v4 = vmul.f32 %v4374_v62, %v4374_v62  ;;  %v188_v5 = vmul.f32 %v4376_v63, %v4376_v63  ;;  %v189_v6 = vmul.f32 %v4378_v0, %v4378_v0  ;;  %v190_v8 = vmul.f32 %v4380_v1, %v4380_v1 }
  0xa5   :  { %v207_v9 = vrot.slane %v199_v2, %v4330_v17  ;;  %v214_v10 = vrot.slane %v200_v3, %v4330_v17  ;;  %v376_v61 = vcombine.high %v374_v45, %v374_v45 }
  0xa6   :  { %v216_v11 = vcombine.low %v187_v4, %v188_v5  ;;  %v217_v12 = vcombine.low %v189_v6, %v190_v8 }
  0xa7   :  { %v215_v13 = vcombine.low %v207_v9, %v214_v10 }
  0xa8   :  { %v224_v14 = vrot.slane %v216_v11, %v4330_v17  ;;  %v231_v15 = vrot.slane %v217_v12, %v4330_v17 }
  0xa9   :  { %v235_v16 = vsel %vm99_vm0, %v215_v13, 0.0 }
  0xaa   :  { %236 = vadd.xlane.f32.xlu1 %v235_v16  ;;  %v232_v18 = vcombine.low %v224_v14, %v231_v15 }
  0xac   :  { %v238_v19 = vsel %vm99_vm0, %v232_v18, 0.0 }
  0xae   :  { %239 = vadd.xlane.f32.xlu1 %v238_v19 }
 0x137   :  { %v237_v26 = vpop.xlane.xlu1 %236 }
 0x138   :  { %v241_v27 = vmul.f32 0.03125, %v237_v26 }
 0x13a   :  { %v243_v28 = vadd.f32 1e-05, %v241_v27 }
 0x13b   :  { %v240_v29 = vpop.xlane.xlu1 %239 }
 0x13c   :  { %4134 = vrsqrt.f32 %v243_v28  ;;  %v242_v30 = vmul.f32 0.03125, %v240_v29 }
 0x13e   :  { %v244_v32 = vadd.f32 1e-05, %v242_v30  ;;  %v3793_v30 = vld [vmem:[%s5037_s4] ss:$0 sm:$0xff]  ;;  %s4222_s4 = smov 96  }
 0x140   :  { %4136 = vrsqrt.f32 %v244_v32 }
 0x146   :  { %v4135_v43 = vpop.eup %4134 }
 0x147   :  { %v255_v46 = vrot.slane %v4135_v43, %v4339_v38  ;;  %v262_v47 = vrot.slane %v4135_v43, %v4342_v39  ;;  %v269_v48 = vrot.slane %v4135_v43, %v4345_v40  ;;  %v276_v49 = vrot.slane %v4135_v43, %v4348_v41 }
 0x149   :  { %v313_v56 = vmul.f32 %v255_v46, %v4354_v50  ;;  %v314_v57 = vmul.f32 %v262_v47, %v4356_v51  ;;  %v315_v58 = vmul.f32 %v269_v48, %v4358_v52  ;;  %v316_v59 = vmul.f32 %v276_v49, %v4360_v53 }
 0x14a   :  { %v4137_v60 = vpop.eup %4136  ;;  %v4225_v46 = vmov 1934713408  }
 0x14b   :  { %v290_v2 = vrot.slane %v4137_v60, %v4342_v39  ;;  %v304_v3 = vrot.slane %v4137_v60, %v4348_v41  ;;  %v347_v4 = vmul.f32 %v333_v35, %v313_v56  ;;  %v348_v5 = vmul.f32 %v341_v44, %v314_v57 }
 0x14c   :  { %v349_v6 = vmul.f32 %v340_v37, %v315_v58  ;;  %v350_v8 = vmul.f32 %v342_v54, %v316_v59  ;;  %v283_v9 = vrot.slane %v4137_v60, %v4339_v38  ;;  %v297_v50 = vrot.slane %v4137_v60, %v4345_v40 }
 0x14d   :  { %v318_v51 = vmul.f32 %v290_v2, %v4376_v63  ;;  %v320_v52 = vmul.f32 %v304_v3, %v4380_v1  ;;  %v381_v10 = vadd.f32 %v367_v42, %v347_v4  ;;  %v382_v53 = vadd.f32 %v375_v55, %v348_v5 }
 0x14e   :  { %v383_v11 = vadd.f32 %v374_v45, %v349_v6  ;;  %v384_v12 = vadd.f32 %v376_v61, %v350_v8  ;;  %v317_v13 = vmul.f32 %v283_v9, %v4374_v62  ;;  %v319_v14 = vmul.f32 %v297_v50, %v4378_v0 }
 0x14f   :  { %v352_v15 = vmul.f32 %v341_v44, %v318_v51  ;;  %v354_v16 = vmul.f32 %v342_v54, %v320_v52  ;;  %v408_v18 = vcombine.low %v381_v10, %v382_v53  ;;  %v576_v47 = vunpack.c.l.s4 %v4225_v46 }
 0x150   :  { %v409_v19 = vcombine.low %v383_v11, %v384_v12  ;;  %v351_v20 = vmul.f32 %v333_v35, %v317_v13  ;;  %v353_v21 = vmul.f32 %v340_v37, %v319_v14 }
 0x151   :  { %v386_v22 = vadd.f32 %v375_v55, %v352_v15  ;;  %v388_v23 = vadd.f32 %v376_v61, %v354_v16  ;;  %v416_v63 = vrot.slane %v408_v18, %v4330_v17  ;;  %v577_v60 = vunpack.c.0.s8 %v576_v47 }
 0x152   :  { %v423_v1 = vrot.slane %v409_v19, %v4330_v17  ;;  %v385_v24 = vadd.f32 %v367_v42, %v351_v20  ;;  %v387_v25 = vadd.f32 %v374_v45, %v353_v21  ;;  %v4223_v45 = vmov 0.0  }
 0x153   :  { %3922 = vmatprep.subr.mxu1 %v4223_v45  ;;  %3932 = vmatprep.subr.mxu0 %v4223_v45  ;;  %v4504_v50 = vsub.s32 %v577_v60, %v4315_v7 }
 0x154   :  { %v424_v26 = vcombine.low %v416_v63, %v423_v1  ;;  %v425_v27 = vcombine.low %v385_v24, %v386_v22  ;;  %v426_v28 = vcombine.low %v387_v25, %v388_v23  ;;  %3934 = vmatprep.mubr.msk.f32.mxu0 %vm4224_vm1, %v4223_v45 }
 0x156   :  { %3919 = vmatprep.mubr.msk.f32.mxu1 %vm99_vm0, %v424_v26  ;;  %v433_v62 = vrot.slane %v425_v27, %v4330_v17  ;;  %v440_v0 = vrot.slane %v426_v28, %v4330_v17 }
 0x158   :  { %v441_v29 = vcombine.low %v433_v62, %v440_v0 }
 0x15a   :  { %3920 = vmatmul.mubr.msk.f32.vlgmr.msra.gmra.mrb[0].mxu1 %vm99_vm0, %v441_v29 }
 0x15b   :  { %3924 = vmatprep.mubr.msk.f32.mxu1 %vm4224_vm1, %v4223_v45 }
 0x22d   :  { %v3921_v31 = vpop.f32.mrb[0].mxu1 }
 0x22e   :  { %v4443_v32 = vadd.f32 %v3921_v31, %v3793_v30  ;;  %v512_v33 = vpop.f32.mrb[1].mxu1 }
 0x22f   :  { %v4445_v34 = vadd.f32 %v3793_v30, %v512_v33 }
 0x230   :  { %525 = vrot.lane.b32.xlu1 %v4443_v32, %s4219_s3 }
 0x231   :  { %523 = vrot.lane.b32.xlu0 %v4445_v34, %s4219_s3 }
 0x234   :  { %531 = vrot.lane.b32.xlu1 %v4443_v32, %s4220_s19 }
 0x235   :  { %535 = vrot.lane.b32.xlu0 %v4445_v34, %s4221_s20 }
 0x238   :  { %529 = vrot.lane.b32.xlu1 %v4445_v34, %s4220_s19 }
 0x239   :  { %813 = vrot.lane.b32.xlu0 %v4445_v34, %s4222_s4 }
 0x23c   :  { %537 = vrot.lane.b32.xlu1 %v4443_v32, %s4221_s20 }
 0x240   :  { %815 = vrot.lane.b32.xlu1 %v4443_v32, %s4222_s4 }
 0x2a2   :  { %v4455_v35 = vpop.permute.xlu1 %525 }
 0x2a3   :  { %819 = vrot.lane.b32.xlu1 %v4455_v35, %s4222_s4  ;;  %v4458_v36 = vpop.permute.xlu0 %523 }
 0x2a4   :  { %817 = vrot.lane.b32.xlu0 %v4458_v36, %s4222_s4 }
 0x2a6   :  { %v4461_v37 = vpop.permute.xlu1 %531 }
 0x2a7   :  { %823 = vrot.lane.b32.xlu1 %v4461_v37, %s4222_s4  ;;  %v4469_v44 = vpop.permute.xlu0 %535  ;;  %v609_v58 = vcombine.low %v4443_v32, %v4461_v37  ;;  %v610_v59 = vcombine.high %v4443_v32, %v4461_v37 }
 0x2a8   :  { %v557_v54 = vcombine.low %v4458_v36, %v4469_v44  ;;  %v558_v55 = vcombine.high %v4458_v36, %v4469_v44 }
 0x2a9   :  { %v617_v8 = vrot.slane %v609_v58, %v4330_v17  ;;  %v624_v9 = vrot.slane %v610_v59, %v4330_v17 }
 0x2aa   :  { %v4464_v42 = vpop.permute.xlu1 %529  ;;  %v565_v3 = vrot.slane %v557_v54, %v4330_v17  ;;  %v572_v4 = vrot.slane %v558_v55, %v4330_v17 }
 0x2ab   :  { %821 = vrot.lane.b32.xlu0 %v4464_v42, %s4222_s4  ;;  %v541_v48 = vcombine.low %v4445_v34, %v4464_v42  ;;  %v542_v49 = vcombine.high %v4445_v34, %v4464_v42  ;;  %v814_v12 = vpop.permute.xlu0 %813 }
 0x2ad   :  { %v549_v61 = vrot.slane %v541_v48, %v4330_v17  ;;  %v556_v2 = vrot.slane %v542_v49, %v4330_v17 }
 0x2ae   :  { %v4467_v43 = vpop.permute.xlu1 %537 }
 0x2af   :  { %827 = vrot.lane.b32.xlu1 %v4467_v43, %s4222_s4  ;;  %825 = vrot.lane.b32.xlu0 %v4469_v44, %s4222_s4  ;;  %v625_v56 = vcombine.low %v4455_v35, %v4467_v43  ;;  %v626_v57 = vcombine.high %v4455_v35, %v4467_v43  ;;  %v573_v52 = vcombine.low %v549_v61, %v565_v3 }
 0x2b0   :  { %v574_v10 = vcombine.high %v549_v61, %v565_v3  ;;  %v589_v53 = vcombine.low %v556_v2, %v572_v4  ;;  %v590_v11 = vcombine.high %v556_v2, %v572_v4 }
 0x2b1   :  { %v633_v5 = vrot.slane %v625_v56, %v4330_v17  ;;  %v640_v6 = vrot.slane %v626_v57, %v4330_v17  ;;  %v581_v19 = vrot.slane %v573_v52, %v4504_v50 }
 0x2b2   :  { %v816_v51 = vpop.permute.xlu1 %815  ;;  %v588_v20 = vrot.slane %v574_v10, %v4504_v50  ;;  %v597_v21 = vrot.slane %v589_v53, %v4504_v50  ;;  %v604_v7 = vrot.slane %v590_v11, %v4504_v50 }
 0x2b3   :  { %v641_v13 = vcombine.low %v617_v8, %v633_v5  ;;  %v642_v14 = vcombine.high %v617_v8, %v633_v5  ;;  %v657_v15 = vcombine.low %v624_v9, %v640_v6  ;;  %v658_v16 = vcombine.high %v624_v9, %v640_v6 }
 0x2b4   :  { %v677_v25 = vcombine.low %v581_v19, %v597_v21  ;;  %v685_v26 = vcombine.low %v588_v20, %v604_v7  ;;  %v3796_v27 = vcombine.high %v581_v19, %v597_v21  ;;  %v3797_v28 = vcombine.high %v588_v20, %v604_v7 }
 0x2b5   :  { %v649_v23 = vrot.slane %v641_v13, %v4504_v50  ;;  %v656_v63 = vrot.slane %v642_v14, %v4504_v50  ;;  %v665_v1 = vrot.slane %v657_v15, %v4504_v50  ;;  %v672_v24 = vrot.slane %v658_v16, %v4504_v50 }
 0x2b6   :  { %v4515_v46 = vrot.slane %v677_v25, %v4330_v17  ;;  %v4518_v47 = vrot.slane %v685_v26, %v4330_v17  ;;  %v4521_v54 = vrot.slane %v3796_v27, %v4330_v17  ;;  %v4524_v55 = vrot.slane %v3797_v28, %v4330_v17 }
 0x2b7   :  { %v693_v29 = vcombine.low %v649_v23, %v665_v1  ;;  %v701_v30 = vcombine.low %v656_v63, %v672_v24  ;;  %v3798_v31 = vcombine.high %v649_v23, %v665_v1  ;;  %v3799_v33 = vcombine.high %v656_v63, %v672_v24 }
 0x2b9   :  { %v4527_v59 = vrot.slane %v693_v29, %v4330_v17  ;;  %v4530_v60 = vrot.slane %v701_v30, %v4330_v17  ;;  %v4533_v4 = vrot.slane %v3798_v31, %v4330_v17  ;;  %v4536_v5 = vrot.slane %v3799_v33, %v4330_v17 }
 0x315   :  { %v820_v18 = vpop.permute.xlu1 %819 }
 0x316   :  { %v818_v22 = vpop.permute.xlu0 %817 }
 0x319   :  { %v824_v62 = vpop.permute.xlu1 %823 }
 0x31a   :  { %v905_v48 = vcombine.low %v816_v51, %v824_v62  ;;  %v906_v49 = vcombine.high %v816_v51, %v824_v62 }
 0x31c   :  { %v913_v9 = vrot.slane %v905_v48, %v4330_v17  ;;  %v920_v51 = vrot.slane %v906_v49, %v4330_v17 }
 0x31d   :  { %v822_v0 = vpop.permute.xlu0 %821 }
 0x31e   :  { %v837_v56 = vcombine.low %v814_v12, %v822_v0  ;;  %v838_v57 = vcombine.high %v814_v12, %v822_v0 }
 0x320   :  { %v845_v53 = vrot.slane %v837_v56, %v4330_v17  ;;  %v852_v11 = vrot.slane %v838_v57, %v4330_v17 }
 0x321   :  { %v828_v58 = vpop.permute.xlu1 %827  ;;  %v826_v3 = vpop.permute.xlu0 %825 }
 0x322   :  { %v921_v61 = vcombine.low %v820_v18, %v828_v58  ;;  %v922_v2 = vcombine.high %v820_v18, %v828_v58  ;;  %v853_v6 = vcombine.low %v818_v22, %v826_v3  ;;  %v854_v8 = vcombine.high %v818_v22, %v826_v3 }
 0x324   :  { %v929_v52 = vrot.slane %v921_v61, %v4330_v17  ;;  %v936_v10 = vrot.slane %v922_v2, %v4330_v17  ;;  %v861_v12 = vrot.slane %v853_v6, %v4330_v17  ;;  %v868_v13 = vrot.slane %v854_v8, %v4330_v17 }
 0x326   :  { %v937_v14 = vcombine.low %v913_v9, %v929_v52  ;;  %v938_v15 = vcombine.high %v913_v9, %v929_v52  ;;  %v953_v16 = vcombine.low %v920_v51, %v936_v10  ;;  %v954_v18 = vcombine.high %v920_v51, %v936_v10 }
 0x327   :  { %v869_v19 = vcombine.low %v845_v53, %v861_v12  ;;  %v870_v20 = vcombine.high %v845_v53, %v861_v12  ;;  %v885_v21 = vcombine.low %v852_v11, %v868_v13  ;;  %v886_v7 = vcombine.high %v852_v11, %v868_v13 }
 0x328   :  { %v945_v22 = vrot.slane %v937_v14, %v4504_v50  ;;  %v952_v23 = vrot.slane %v938_v15, %v4504_v50  ;;  %v961_v63 = vrot.slane %v953_v16, %v4504_v50  ;;  %v968_v1 = vrot.slane %v954_v18, %v4504_v50 }
 0x329   :  { %v877_v24 = vrot.slane %v869_v19, %v4504_v50  ;;  %v884_v25 = vrot.slane %v870_v20, %v4504_v50  ;;  %v893_v26 = vrot.slane %v885_v21, %v4504_v50  ;;  %v900_v27 = vrot.slane %v886_v7, %v4504_v50 }
 0x32a   :  { %v989_v28 = vcombine.low %v945_v22, %v961_v63  ;;  %v997_v62 = vcombine.low %v952_v23, %v968_v1  ;;  %v3802_v0 = vcombine.high %v945_v22, %v961_v63  ;;  %v3803_v29 = vcombine.high %v952_v23, %v968_v1 }
 0x32b   :  { %v973_v30 = vcombine.low %v877_v24, %v893_v26  ;;  %v981_v31 = vcombine.low %v884_v25, %v900_v27  ;;  %v3800_v33 = vcombine.high %v877_v24, %v893_v26  ;;  %v3801_v48 = vcombine.high %v884_v25, %v900_v27 }
 0x32c   :  { %v996_v49 = vrot.slane %v989_v28, %v4330_v17  ;;  %v1004_v56 = vrot.slane %v997_v62, %v4330_v17  ;;  %v1064_v57 = vrot.slane %v3802_v0, %v4330_v17  ;;  %v1072_v58 = vrot.slane %v3803_v29, %v4330_v17 }
 0x32d   :  { %v980_v61 = vrot.slane %v973_v30, %v4330_v17  ;;  %v988_v2 = vrot.slane %v981_v31, %v4330_v17  ;;  %v1048_v3 = vrot.slane %v3800_v33, %v4330_v17  ;;  %v1056_v6 = vrot.slane %v3801_v48, %v4330_v17 }
 0x32e   :  { %v1021_v8 = vcombine.low %v996_v49, %v1004_v56  ;;  %v1022_v9 = vcombine.high %v996_v49, %v1004_v56  ;;  %v725_v51 = vcombine.low %v4527_v59, %v4530_v60  ;;  %v726_v52 = vcombine.high %v4527_v59, %v4530_v60 }
 0x32f   :  { %v1089_v10 = vcombine.low %v1064_v57, %v1072_v58  ;;  %v1005_v53 = vcombine.low %v980_v61, %v988_v2  ;;  %v1073_v11 = vcombine.low %v1048_v3, %v1056_v6  ;;  %v1006_v12 = vcombine.high %v980_v61, %v988_v2 }
 0x330   :  { %v1029_v13 = vrot.slane %v1021_v8, %v4504_v50  ;;  %v1036_v14 = vrot.slane %v1022_v9, %v4504_v50  ;;  %v709_v15 = vcombine.low %v4515_v46, %v4518_v47  ;;  %v710_v16 = vcombine.high %v4515_v46, %v4518_v47 }
 0x331   :  { %v1013_v18 = vrot.slane %v1005_v53, %v4504_v50  ;;  %v1020_v19 = vrot.slane %v1006_v12, %v4504_v50  ;;  %v793_v59 = vcombine.low %v4533_v4, %v4536_v5  ;;  %v1090_v60 = vcombine.high %v1064_v57, %v1072_v58 }
 0x332   :  { %v1074_v20 = vcombine.high %v1048_v3, %v1056_v6  ;;  %v733_v21 = vrot.slane %v725_v51, %v4504_v50  ;;  %v740_v7 = vrot.slane %v726_v52, %v4504_v50  ;;  %v1081_v63 = vrot.slane %v1073_v11, %v4504_v50 }
 0x333   :  { %v1037_v22 = vcombine.low %v1013_v18, %v1029_v13  ;;  %v1039_v23 = vcombine.low %v1020_v19, %v1036_v14  ;;  %v1097_v46 = vrot.slane %v1089_v10, %v4504_v50  ;;  %v717_v47 = vrot.slane %v709_v15, %v4504_v50 }
 0x334   :  { %v724_v1 = vrot.slane %v710_v16, %v4504_v50  ;;  %v777_v24 = vcombine.low %v4521_v54, %v4524_v55  ;;  %v794_v25 = vcombine.high %v4533_v4, %v4536_v5  ;;  %v801_v28 = vrot.slane %v793_v59, %v4504_v50 }
 0x335   :  { %3923 = vmatpush3.xpose.msk.msra.mxu1 %vm1405_vm2, %v1037_v22  ;;  %3933 = vmatpush3.xpose.msk.msra.mxu0 %vm1405_vm2, %v1039_v23  ;;  %v741_v26 = vcombine.low %v717_v47, %v733_v21  ;;  %v1038_v62 = vcombine.high %v1013_v18, %v1029_v13  ;;  %v1105_v0 = vcombine.low %v1081_v63, %v1097_v46 }
 0x336   :  { %3927 = vmatprep.subr.mxu1 %v4223_v45  ;;  %v743_v27 = vcombine.low %v724_v1, %v740_v7  ;;  %3942 = vmatprep.subr.mxu0 %v4223_v45  ;;  %v1088_v29 = vrot.slane %v1074_v20, %v4504_v50  ;;  %v1104_v30 = vrot.slane %v1090_v60, %v4504_v50 }
 0x337   :  { %v785_v4 = vrot.slane %v777_v24, %v4504_v50  ;;  %v778_v5 = vcombine.high %v4521_v54, %v4524_v55  ;;  %v742_v31 = vcombine.high %v717_v47, %v733_v21  ;;  %v808_v48 = vrot.slane %v794_v25, %v4504_v50 }
 0x338   :  { %3925 = vmatmul.mubr.msk.f32.vlgmr.msra.gmra.mrb[2].mxu1 %vm1405_vm2, %v741_v26  ;;  %3935 = vmatmul.mubr.msk.f32.vlgmr.msra.gmra.mrb[0].mxu0 %vm1405_vm2, %v743_v27  ;;  %v1040_v49 = vcombine.high %v1020_v19, %v1036_v14  ;;  %v1107_v54 = vcombine.low %v1088_v29, %v1104_v30  ;;  %v744_v56 = vcombine.high %v724_v1, %v740_v7 }
 0x339   :  { %3928 = vmatpush3.xpose.msk.msra.mxu1 %vm1405_vm2, %v1038_v62  ;;  %3943 = vmatpush3.xpose.msk.msra.mxu0 %vm1405_vm2, %v1105_v0  ;;  %v809_v33 = vcombine.low %v785_v4, %v801_v28  ;;  %v792_v55 = vrot.slane %v778_v5, %v4504_v50  ;;  %v1106_v58 = vcombine.high %v1081_v63, %v1097_v46 }
 0x33a   :  { %3929 = vmatprep.mubr.msk.f32.mxu1 %vm4224_vm1, %v4223_v45  ;;  %3944 = vmatprep.mubr.msk.f32.mxu0 %vm4224_vm1, %v4223_v45  ;;  %v810_v61 = vcombine.high %v785_v4, %v801_v28  ;;  %v1108_v2 = vcombine.high %v1088_v29, %v1104_v30 }
 0x33b   :  { %3937 = vmatprep.subr.mxu1 %v4223_v45  ;;  %3952 = vmatprep.subr.mxu0 %v4223_v45  ;;  %v811_v57 = vcombine.low %v792_v55, %v808_v48  ;;  %v812_v3 = vcombine.high %v792_v55, %v808_v48 }
 0x33c   :  { %3930 = vmatmul.mubr.msk.f32.vlgmr.msra.gmra.mrb[4].mxu1 %vm1405_vm2, %v742_v31  ;;  %3945 = vmatmul.mubr.msk.f32.vlgmr.msra.gmra.mrb[2].mxu0 %vm1405_vm2, %v809_v33 }
 0x33d   :  { %3938 = vmatpush3.xpose.msk.msra.mxu1 %vm1405_vm2, %v1040_v49  ;;  %3953 = vmatpush3.xpose.msk.msra.mxu0 %vm1405_vm2, %v1107_v54 }
 0x33e   :  { %3939 = vmatprep.mubr.msk.f32.mxu1 %vm4224_vm1, %v4223_v45  ;;  %3954 = vmatprep.mubr.msk.f32.mxu0 %vm4224_vm1, %v4223_v45 }
 0x33f   :  { %3947 = vmatprep.subr.mxu1 %v4223_v45  ;;  %3962 = vmatprep.subr.mxu0 %v4223_v45 }
 0x340   :  { %3940 = vmatmul.mubr.msk.f32.vlgmr.msra.gmra.mrb[6].mxu1 %vm1405_vm2, %v744_v56  ;;  %3955 = vmatmul.mubr.msk.f32.vlgmr.msra.gmra.mrb[4].mxu0 %vm1405_vm2, %v811_v57 }
 0x341   :  { %3948 = vmatpush3.xpose.msk.msra.mxu1 %vm1405_vm2, %v1106_v58  ;;  %3949 = vmatprep.mubr.msk.f32.mxu1 %vm4224_vm1, %v4223_v45 }
 0x342   :  { %3957 = vmatprep.subr.mxu1 %v4223_v45  ;;  %3964 = vmatprep.mubr.msk.f32.mxu0 %vm4224_vm1, %v4223_v45 }
 0x344   :  { %3950 = vmatmul.mubr.msk.f32.vlgmr.msra.gmra.mrb[8].mxu1 %vm1405_vm2, %v810_v61 }
 0x345   :  { %3958 = vmatpush3.xpose.msk.msra.mxu1 %vm1405_vm2, %v1108_v2  ;;  %3959 = vmatprep.mubr.msk.f32.mxu1 %vm4224_vm1, %v4223_v45 }
 0x346   :  { %3967 = vmatprep.subr.mxu1 %v4223_v45 }
 0x348   :  { %3960 = vmatmul.mubr.msk.f32.vlgmr.msra.gmra.mrb[10].mxu1 %vm1405_vm2, %v812_v3 }
 0x349   :  { %3969 = vmatprep.mubr.msk.f32.mxu1 %vm4224_vm1, %v4223_v45 }
 0x40b   :  { %v1478_v6 = vpop.f32.mrb[2].mxu1  ;;  %v1630_v8 = vpop.f32.mrb[0].mxu0 }
 0x40c   :  { %v3926_v9 = vpop.f32.mrb[3].mxu1  ;;  %v3936_v51 = vpop.f32.mrb[1].mxu0  ;;  %v2014_v52 = vsel %vm1405_vm2, %v1478_v6, -inf  ;;  %v2020_v13 = vsel %vm1405_vm2, %v1630_v8, -inf }
 0x40d   :  { %2015 = vmax.xlane.f32.xlu0 %v2014_v52 }
 0x40f   :  { %v1554_v10 = vpop.f32.mrb[4].mxu1  ;;  %v1782_v53 = vpop.f32.mrb[2].mxu0 }
 0x410   :  { %v3931_v11 = vpop.f32.mrb[5].mxu1  ;;  %v3946_v12 = vpop.f32.mrb[3].mxu0  ;;  %v2017_v14 = vsel %vm1405_vm2, %v1554_v10, -inf  ;;  %v2026_v21 = vsel %vm1405_vm2, %v1782_v53, -inf }
 0x411   :  { %2021 = vmax.xlane.f32.xlu0 %v2020_v13  ;;  %2018 = vmax.xlane.f32.xlu1 %v2017_v14 }
 0x413   :  { %v1706_v15 = vpop.f32.mrb[6].mxu1  ;;  %v1934_v16 = vpop.f32.mrb[4].mxu0 }
 0x414   :  { %v3941_v18 = vpop.f32.mrb[7].mxu1  ;;  %v3956_v19 = vpop.f32.mrb[5].mxu0  ;;  %v2023_v59 = vsel %vm1405_vm2, %v1706_v15, -inf  ;;  %v2032_v63 = vsel %vm1405_vm2, %v1934_v16, -inf }
 0x415   :  { %2024 = vmax.xlane.f32.xlu0 %v2023_v59 }
 0x417   :  { %v1858_v60 = vpop.f32.mrb[8].mxu1 }
 0x418   :  { %v3951_v20 = vpop.f32.mrb[9].mxu1  ;;  %v2029_v7 = vsel %vm1405_vm2, %v1858_v60, -inf }
 0x419   :  { %2027 = vmax.xlane.f32.xlu0 %v2026_v21  ;;  %2030 = vmax.xlane.f32.xlu1 %v2029_v7 }
 0x41b   :  { %v2010_v22 = vpop.f32.mrb[10].mxu1 }
 0x41c   :  { %v3961_v23 = vpop.f32.mrb[11].mxu1  ;;  %v2035_v46 = vsel %vm1405_vm2, %v2010_v22, -inf }
 0x41d   :  { %2033 = vmax.xlane.f32.xlu0 %v2032_v63  ;;  %2036 = vmax.xlane.f32.xlu1 %v2035_v46 }
 0x42e   :  { %1111 = vrot.lane.b32.xlu1 %v4443_v32, %s4226_s21 }
 0x432   :  { %1113 = vrot.lane.b32.xlu1 %v4458_v36, %s4226_s21 }
 0x433   :  { %1109 = vrot.lane.b32.xlu0 %v4445_v34, %s4226_s21 }
 0x436   :  { %1115 = vrot.lane.b32.xlu1 %v4455_v35, %s4226_s21 }
 0x437   :  { %1117 = vrot.lane.b32.xlu0 %v4464_v42, %s4226_s21 }
 0x43a   :  { %1119 = vrot.lane.b32.xlu1 %v4461_v37, %s4226_s21 }
 0x43b   :  { %1121 = vrot.lane.b32.xlu0 %v4469_v44, %s4226_s21 }
 0x43e   :  { %1123 = vrot.lane.b32.xlu1 %v4467_v43, %s4226_s21 }
 0x49a   :  { %v2016_v47 = vpop.xlane.xlu0 %2015 }
 0x49b   :  { %v2038_v1 = vsub.f32 %v1478_v6, %v2016_v47 }
 0x49d   :  { %v2046_v24 = vmul.f32 1.442695, %v2038_v1 }
 0x49e   :  { %v2022_v25 = vpop.xlane.xlu0 %2021  ;;  %v2019_v26 = vpop.xlane.xlu1 %2018 }
 0x49f   :  { %4138 = vpow2.f32 %v2046_v24  ;;  %v2040_v32 = vsub.f32 %v1630_v8, %v2022_v25  ;;  %v2039_v36 = vsub.f32 %v1554_v10, %v2019_v26 }
 0x4a1   :  { %v2050_v27 = vmul.f32 1.442695, %v2040_v32  ;;  %v2048_v34 = vmul.f32 1.442695, %v2039_v36 }
 0x4a2   :  { %v2025_v28 = vpop.xlane.xlu0 %2024 }
 0x4a3   :  { %4140 = vpow2.f32 %v2050_v27  ;;  %v2041_v35 = vsub.f32 %v1706_v15, %v2025_v28 }
 0x4a4   :  { %4142 = vpow2.f32 %v2048_v34 }
 0x4a5   :  { %v2052_v42 = vmul.f32 1.442695, %v2041_v35 }
 0x4a6   :  { %v2028_v37 = vpop.xlane.xlu0 %2027  ;;  %v2031_v62 = vpop.xlane.xlu1 %2030 }
 0x4a7   :  { %4144 = vpow2.f32 %v2052_v42  ;;  %v2042_v44 = vsub.f32 %v1782_v53, %v2028_v37  ;;  %v2043_v43 = vsub.f32 %v1858_v60, %v2031_v62 }
 0x4a9   :  { %v4650_v0 = vpop.eup %4138  ;;  %v2054_v29 = vmul.f32 1.442695, %v2042_v44  ;;  %v2056_v30 = vmul.f32 1.442695, %v2043_v43 }
 0x4aa   :  { %v2034_v4 = vpop.xlane.xlu0 %2033  ;;  %v2037_v5 = vpop.xlane.xlu1 %2036  ;;  %v2062_v31 = vsel %vm1405_vm2, %v4650_v0, 0.0 }
 0x4ab   :  { %4146 = vpow2.f32 %v2054_v29  ;;  %v2044_v33 = vsub.f32 %v1934_v16, %v2034_v4  ;;  %v2045_v48 = vsub.f32 %v2010_v22, %v2037_v5  ;;  %2063 = vadd.xlane.f32.xlu0 %v2062_v31 }
 0x4ac   :  { %4148 = vpow2.f32 %v2056_v30 }
 0x4ad   :  { %v4654_v49 = vpop.eup %4140  ;;  %v2058_v54 = vmul.f32 1.442695, %v2044_v33  ;;  %v2060_v55 = vmul.f32 1.442695, %v2045_v48 }
 0x4ae   :  { %v4656_v56 = vpop.eup %4142  ;;  %v1110_v57 = vpop.permute.xlu0 %1109  ;;  %v2068_v61 = vsel %vm1405_vm2, %v4654_v49, 0.0 }
 0x4af   :  { %v1112_v58 = vpop.permute.xlu1 %1111  ;;  %4150 = vpow2.f32 %v2058_v54  ;;  %2069 = vadd.xlane.f32.xlu0 %v2068_v61  ;;  %v2065_v2 = vsel %vm1405_vm2, %v4656_v56, 0.0 }
 0x4b0   :  { %2066 = vadd.xlane.f32.xlu1 %v2065_v2  ;;  %4152 = vpow2.f32 %v2060_v55 }
 0x4b1   :  { %v4662_v3 = vpop.eup %4144 }
 0x4b2   :  { %v1118_v6 = vpop.permute.xlu0 %1117  ;;  %v2071_v9 = vsel %vm1405_vm2, %v4662_v3, 0.0 }
 0x4b3   :  { %v1114_v8 = vpop.permute.xlu1 %1113  ;;  %v1133_v52 = vcombine.low %v1110_v57, %v1118_v6  ;;  %v1134_v10 = vcombine.high %v1110_v57, %v1118_v6 }
 0x4b4   :  { %2072 = vadd.xlane.f32.xlu1 %v2071_v9 }
 0x4b5   :  { %v4666_v51 = vpop.eup %4146  ;;  %v1141_v19 = vrot.slane %v1133_v52, %v4330_v17  ;;  %v1148_v59 = vrot.slane %v1134_v10, %v4330_v17 }
 0x4b6   :  { %v4668_v53 = vpop.eup %4148  ;;  %v1122_v11 = vpop.permute.xlu0 %1121  ;;  %v2074_v13 = vsel %vm1405_vm2, %v4666_v51, 0.0 }
 0x4b7   :  { %v1116_v12 = vpop.permute.xlu1 %1115  ;;  %v1149_v14 = vcombine.low %v1114_v8, %v1122_v11  ;;  %v1150_v15 = vcombine.high %v1114_v8, %v1122_v11  ;;  %2075 = vadd.xlane.f32.xlu0 %v2074_v13  ;;  %v2077_v16 = vsel %vm1405_vm2, %v4668_v53, 0.0 }
 0x4b8   :  { %2078 = vadd.xlane.f32.xlu1 %v2077_v16 }
 0x4b9   :  { %v4674_v18 = vpop.eup %4150  ;;  %v1157_v60 = vrot.slane %v1149_v14, %v4330_v17  ;;  %v1164_v20 = vrot.slane %v1150_v15, %v4330_v17 }
 0x4ba   :  { %v2080_v7 = vsel %vm1405_vm2, %v4674_v18, 0.0  ;;  %v4682_v22 = vpop.eup %4152 }
 0x4bb   :  { %v1120_v21 = vpop.permute.xlu1 %1119  ;;  %v1165_v23 = vcombine.low %v1141_v19, %v1157_v60  ;;  %v1166_v63 = vcombine.high %v1141_v19, %v1157_v60  ;;  %v1181_v46 = vcombine.low %v1148_v59, %v1164_v20  ;;  %v1182_v47 = vcombine.high %v1148_v59, %v1164_v20  ;;  %2081 = vadd.xlane.f32.xlu0 %v2080_v7 }
 0x4bc   :  { %v1201_v32 = vcombine.low %v1112_v58, %v1120_v21  ;;  %v1202_v36 = vcombine.high %v1112_v58, %v1120_v21  ;;  %v2083_v34 = vsel %vm1405_vm2, %v4682_v22, 0.0 }
 0x4bd   :  { %v1173_v1 = vrot.slane %v1165_v23, %v4504_v50  ;;  %v1180_v24 = vrot.slane %v1166_v63, %v4504_v50  ;;  %v1189_v25 = vrot.slane %v1181_v46, %v4504_v50  ;;  %v1196_v26 = vrot.slane %v1182_v47, %v4504_v50 }
 0x4be   :  { %v1209_v5 = vrot.slane %v1201_v32, %v4330_v17  ;;  %v1216_v31 = vrot.slane %v1202_v36, %v4330_v17 }
 0x4bf   :  { %v1124_v27 = vpop.permute.xlu1 %1123  ;;  %v1269_v28 = vcombine.low %v1173_v1, %v1189_v25  ;;  %v1277_v35 = vcombine.low %v1180_v24, %v1196_v26  ;;  %v3804_v42 = vcombine.high %v1173_v1, %v1189_v25  ;;  %v3805_v37 = vcombine.high %v1180_v24, %v1196_v26  ;;  %2084 = vadd.xlane.f32.xlu0 %v2083_v34 }
 0x4c0   :  { %v1217_v62 = vcombine.low %v1116_v12, %v1124_v27  ;;  %v1218_v44 = vcombine.high %v1116_v12, %v1124_v27 }
 0x4c1   :  { %v1276_v43 = vrot.slane %v1269_v28, %v4330_v17  ;;  %v1284_v29 = vrot.slane %v1277_v35, %v4330_v17  ;;  %v1344_v30 = vrot.slane %v3804_v42, %v4330_v17  ;;  %v1352_v4 = vrot.slane %v3805_v37, %v4330_v17 }
 0x4c2   :  { %v1225_v33 = vrot.slane %v1217_v62, %v4330_v17  ;;  %v1232_v48 = vrot.slane %v1218_v44, %v4330_v17 }
 0x4c3   :  { %v1302_v54 = vcombine.high %v1276_v43, %v1284_v29  ;;  %v1369_v55 = vcombine.low %v1344_v30, %v1352_v4  ;;  %v1370_v57 = vcombine.high %v1344_v30, %v1352_v4  ;;  %v1301_v15 = vcombine.low %v1276_v43, %v1284_v29 }
 0x4c4   :  { %v1233_v58 = vcombine.low %v1209_v5, %v1225_v33  ;;  %v1234_v61 = vcombine.high %v1209_v5, %v1225_v33  ;;  %v1249_v2 = vcombine.low %v1216_v31, %v1232_v48  ;;  %v1250_v6 = vcombine.high %v1216_v31, %v1232_v48 }
 0x4c5   :  { %v1309_v63 = vrot.slane %v1301_v15, %v4504_v50  ;;  %v1316_v46 = vrot.slane %v1302_v54, %v4504_v50  ;;  %v1377_v26 = vrot.slane %v1369_v55, %v4504_v50  ;;  %v1384_v32 = vrot.slane %v1370_v57, %v4504_v50 }
 0x4c6   :  { %v1241_v8 = vrot.slane %v1233_v58, %v4504_v50  ;;  %v1248_v9 = vrot.slane %v1234_v61, %v4504_v50  ;;  %v1257_v52 = vrot.slane %v1249_v2, %v4504_v50  ;;  %v1264_v10 = vrot.slane %v1250_v6, %v4504_v50 }
 0x4c8   :  { %v1285_v11 = vcombine.low %v1241_v8, %v1257_v52  ;;  %v1293_v12 = vcombine.low %v1248_v9, %v1264_v10  ;;  %v3806_v13 = vcombine.high %v1241_v8, %v1257_v52  ;;  %v3807_v14 = vcombine.high %v1248_v9, %v1264_v10 }
 0x4ca   :  { %v1292_v16 = vrot.slane %v1285_v11, %v4330_v17  ;;  %v1300_v19 = vrot.slane %v1293_v12, %v4330_v17  ;;  %v1360_v59 = vrot.slane %v3806_v13, %v4330_v17  ;;  %v1368_v60 = vrot.slane %v3807_v14, %v4330_v17 }
 0x4cc   :  { %v1317_v20 = vcombine.low %v1292_v16, %v1300_v19  ;;  %v1318_v21 = vcombine.high %v1292_v16, %v1300_v19  ;;  %v1385_v7 = vcombine.low %v1360_v59, %v1368_v60  ;;  %v1386_v23 = vcombine.high %v1360_v59, %v1368_v60 }
 0x4ce   :  { %v1325_v47 = vrot.slane %v1317_v20, %v4504_v50  ;;  %v1332_v1 = vrot.slane %v1318_v21, %v4504_v50  ;;  %v1393_v24 = vrot.slane %v1385_v7, %v4504_v50  ;;  %v4712_v25 = vrot.slane %v1386_v23, %v4504_v50 }
 0x4d0   :  { %v1333_v36 = vcombine.low %v1309_v63, %v1325_v47  ;;  %v1334_v27 = vcombine.high %v1309_v63, %v1325_v47  ;;  %v1335_v34 = vcombine.low %v1316_v46, %v1332_v1  ;;  %v1336_v28 = vcombine.high %v1316_v46, %v1332_v1 }
 0x4d1   :  { %v1401_v35 = vcombine.low %v1377_v26, %v1393_v24  ;;  %v1402_v42 = vcombine.high %v1377_v26, %v1393_v24  ;;  %v1403_v37 = vcombine.low %v1384_v32, %v4712_v25  ;;  %v1404_v62 = vcombine.high %v1384_v32, %v4712_v25 }
 0x4d2   :  { %3963 = vmatpush3.msra.mxu0 %v1333_v36  ;;  %3968 = vmatpush3.msra.mxu1 %v1334_v27 }
 0x4d3   :  { %3972 = vmatprep.subr.mxu0 %v4223_v45  ;;  %3977 = vmatprep.subr.mxu1 %v4223_v45 }
 0x538   :  { %v2064_v44 = vpop.xlane.xlu0 %2063 }
 0x539   :  { %4154 = vrcp.f32 %v2064_v44 }
 0x53c   :  { %v2070_v43 = vpop.xlane.xlu0 %2069 }
 0x53d   :  { %4156 = vrcp.f32 %v2070_v43  ;;  %v2067_v29 = vpop.xlane.xlu1 %2066 }
 0x53e   :  { %4158 = vrcp.f32 %v2067_v29 }
 0x541   :  { %v2073_v30 = vpop.xlane.xlu1 %2072 }
 0x542   :  { %4160 = vrcp.f32 %v2073_v30 }
 0x543   :  { %v4155_v4 = vpop.eup %4154 }
 0x544   :  { %v2087_v5 = vmul.f32 %v4155_v4, %v4650_v0  ;;  %v2076_v31 = vpop.xlane.xlu0 %2075 }
 0x545   :  { %4162 = vrcp.f32 %v2076_v31  ;;  %v2079_v33 = vpop.xlane.xlu1 %2078 }
 0x546   :  { %4164 = vrcp.f32 %v2079_v33  ;;  %3965 = vmatmul.mubr.msk.f32.vlgmr.msra.gmra.mrb[6].mxu0 %vm1405_vm2, %v2087_v5 }
 0x547   :  { %v4157_v48 = vpop.eup %4156  ;;  %3973 = vmatpush3.msra.mxu0 %v1335_v34  ;;  %3974 = vmatprep.mubr.msk.f32.mxu0 %vm4224_vm1, %v4223_v45 }
 0x548   :  { %v4159_v54 = vpop.eup %4158  ;;  %v2091_v55 = vmul.f32 %v4157_v48, %v4654_v49  ;;  %v2082_v57 = vpop.xlane.xlu0 %2081  ;;  %3982 = vmatprep.subr.mxu0 %v4223_v45 }
 0x549   :  { %v2089_v58 = vmul.f32 %v4159_v54, %v4656_v56  ;;  %4166 = vrcp.f32 %v2082_v57 }
 0x54a   :  { %3975 = vmatmul.mubr.msk.f32.vlgmr.msra.gmra.mrb[8].mxu0 %vm1405_vm2, %v2091_v55 }
 0x54b   :  { %3970 = vmatmul.mubr.msk.f32.vlgmr.msra.gmra.mrb[12].mxu1 %vm1405_vm2, %v2089_v58  ;;  %3983 = vmatpush3.msra.mxu0 %v1401_v35 }
 0x54c   :  { %v4161_v0 = vpop.eup %4160  ;;  %3978 = vmatpush3.msra.mxu1 %v1336_v28  ;;  %v2085_v61 = vpop.xlane.xlu0 %2084  ;;  %3979 = vmatprep.mubr.msk.f32.mxu1 %vm4224_vm1, %v4223_v45 }
 0x54d   :  { %v2093_v2 = vmul.f32 %v4161_v0, %v4662_v3  ;;  %4168 = vrcp.f32 %v2085_v61  ;;  %3987 = vmatprep.subr.mxu1 %v4223_v45  ;;  %3984 = vmatprep.mubr.msk.f32.mxu0 %vm4224_vm1, %v4223_v45 }
 0x54e   :  { %3992 = vmatprep.subr.mxu0 %v4223_v45 }
 0x54f   :  { %v4163_v49 = vpop.eup %4162  ;;  %3980 = vmatmul.mubr.msk.f32.vlgmr.msra.gmra.mrb[14].mxu1 %vm1405_vm2, %v2093_v2 }
 0x550   :  { %v4165_v56 = vpop.eup %4164  ;;  %v2095_v6 = vmul.f32 %v4163_v49, %v4666_v51  ;;  %3988 = vmatpush3.msra.mxu1 %v1402_v42  ;;  %3989 = vmatprep.mubr.msk.f32.mxu1 %vm4224_vm1, %v4223_v45 }
 0x551   :  { %v2097_v3 = vmul.f32 %v4165_v56, %v4668_v53  ;;  %3997 = vmatprep.subr.mxu1 %v4223_v45 }
 0x552   :  { %3985 = vmatmul.mubr.msk.f32.vlgmr.msra.gmra.mrb[10].mxu0 %vm1405_vm2, %v2095_v6 }
 0x553   :  { %v4167_v8 = vpop.eup %4166  ;;  %3990 = vmatmul.mubr.msk.f32.vlgmr.msra.gmra.mrb[16].mxu1 %vm1405_vm2, %v2097_v3  ;;  %3993 = vmatpush3.msra.mxu0 %v1403_v37 }
 0x554   :  { %v2099_v9 = vmul.f32 %v4167_v8, %v4674_v18  ;;  %3998 = vmatpush3.msra.mxu1 %v1404_v62  ;;  %3994 = vmatprep.mubr.msk.f32.mxu0 %vm4224_vm1, %v4223_v45 }
 0x555   :  { %3999 = vmatprep.mubr.msk.f32.mxu1 %vm4224_vm1, %v4223_v45 }
 0x556   :  { %3995 = vmatmul.mubr.msk.f32.vlgmr.msra.gmra.mrb[12].mxu0 %vm1405_vm2, %v2099_v9 }
 0x557   :  { %v4169_v51 = vpop.eup %4168 }
 0x558   :  { %v2101_v53 = vmul.f32 %v4169_v51, %v4682_v22 }
 0x55a   :  { %4000 = vmatmul.mubr.msk.f32.vlgmr.msra.gmra.mrb[18].mxu1 %vm1405_vm2, %v2101_v53 }
 0x619   :  { %v2171_v52 = vpop.f32.mrb[6].mxu0 }
 0x61a   :  { %v3966_v10 = vpop.f32.mrb[7].mxu0 }
 0x61d   :  { %v2317_v11 = vpop.f32.mrb[8].mxu0 }
 0x61e   :  { %v2244_v12 = vpop.f32.mrb[12].mxu1  ;;  %v2686_v13 = vcombine.low %v2171_v52, %v2317_v11  ;;  %v2687_v18 = vcombine.high %v2171_v52, %v2317_v11  ;;  %v3976_v14 = vpop.f32.mrb[9].mxu0 }
 0x61f   :  { %v3971_v15 = vpop.f32.mrb[13].mxu1 }
 0x620   :  { %v2694_v20 = vrot.slane %v2686_v13, %v4330_v17  ;;  %v2701_v21 = vrot.slane %v2687_v18, %v4330_v17 }
 0x622   :  { %v2390_v16 = vpop.f32.mrb[14].mxu1 }
 0x623   :  { %v2702_v19 = vcombine.low %v2244_v12, %v2390_v16  ;;  %v2703_v59 = vcombine.high %v2244_v12, %v2390_v16  ;;  %v3981_v60 = vpop.f32.mrb[15].mxu1 }
 0x624   :  { %v2990_v60 = vld [vmem:[%s5038_s5] sm:$0xff] }
 0x625   :  { %v2710_v22 = vrot.slane %v2702_v19, %v4330_v17  ;;  %v2717_v7 = vrot.slane %v2703_v59, %v4330_v17  ;;  %v2463_v23 = vpop.f32.mrb[10].mxu0 }
 0x626   :  { %v2536_v63 = vpop.f32.mrb[16].mxu1  ;;  %v3986_v46 = vpop.f32.mrb[11].mxu0 }
 0x627   :  { %v2718_v47 = vcombine.low %v2694_v20, %v2710_v22  ;;  %v2719_v1 = vcombine.high %v2694_v20, %v2710_v22  ;;  %v2734_v24 = vcombine.low %v2701_v21, %v2717_v7  ;;  %v2735_v25 = vcombine.high %v2701_v21, %v2717_v7  ;;  %v3991_v26 = vpop.f32.mrb[17].mxu1 }
 0x629   :  { %v2609_v32 = vpop.f32.mrb[12].mxu0  ;;  %v2726_v28 = vrot.slane %v2718_v47, %v4504_v50  ;;  %v2733_v35 = vrot.slane %v2719_v1, %v4504_v50  ;;  %v2742_v42 = vrot.slane %v2734_v24, %v4504_v50  ;;  %v2749_v37 = vrot.slane %v2735_v25, %v4504_v50 }
 0x62a   :  { %v2754_v36 = vcombine.low %v2463_v23, %v2609_v32  ;;  %v2755_v27 = vcombine.high %v2463_v23, %v2609_v32  ;;  %v3996_v34 = vpop.f32.mrb[13].mxu0 }
 0x62b   :  { %v2750_v33 = vcombine.high %v2726_v28, %v4223_v45  ;;  %v2751_v48 = vcombine.high %v2733_v35, %v4223_v45  ;;  %v2752_v54 = vcombine.high %v2742_v42, %v4223_v45  ;;  %v2753_v55 = vcombine.high %v2749_v37, %v4223_v45 }
 0x62c   :  { %v2762_v30 = vrot.slane %v2754_v36, %v4330_v17  ;;  %v2769_v4 = vrot.slane %v2755_v27, %v4330_v17 }
 0x62d   :  { %v2682_v62 = vpop.f32.mrb[18].mxu1  ;;  %v2822_v3 = vcombine.low %v2726_v28, %v2750_v33  ;;  %v2838_v8 = vcombine.low %v2733_v35, %v2751_v48  ;;  %v2890_v9 = vcombine.low %v2742_v42, %v2752_v54  ;;  %v2906_v51 = vcombine.low %v2749_v37, %v2753_v55 }
 0x62e   :  { %v2770_v44 = vcombine.low %v2536_v63, %v2682_v62  ;;  %v2771_v43 = vcombine.high %v2536_v63, %v2682_v62  ;;  %v4001_v29 = vpop.f32.mrb[19].mxu1 }
 0x62f   :  { %v2897_v15 = vrot.slane %v2890_v9, %v4330_v17  ;;  %v2913_v16 = vrot.slane %v2906_v51, %v4330_v17  ;;  %v2829_v19 = vrot.slane %v2822_v3, %v4330_v17  ;;  %v2845_v59 = vrot.slane %v2838_v8, %v4330_v17  ;;  %v3832_v51 = vld [vmem:[%s5039_s6] ss:$0 sm:$0xff] }
 0x630   :  { %v2778_v5 = vrot.slane %v2770_v44, %v4330_v17  ;;  %v2785_v31 = vrot.slane %v2771_v43, %v4330_v17  ;;  %v2992_v44 = vld [vmem:[%s5038_s5 + $0x10] sm:$0xff]  ;;  %v2993_v43 = vld [vmem:[%s5038_s5 + $0x18] sm:$0xff] }
 0x632   :  { %v2786_v57 = vcombine.low %v2762_v30, %v2778_v5  ;;  %v2787_v58 = vcombine.high %v2762_v30, %v2778_v5  ;;  %v2802_v0 = vcombine.low %v2769_v4, %v2785_v31  ;;  %v2803_v61 = vcombine.high %v2769_v4, %v2785_v31 }
 0x634   :  { %v2794_v2 = vrot.slane %v2786_v57, %v4504_v50  ;;  %v2801_v49 = vrot.slane %v2787_v58, %v4504_v50  ;;  %v2810_v56 = vrot.slane %v2802_v0, %v4504_v50  ;;  %v2817_v6 = vrot.slane %v2803_v61, %v4504_v50 }
 0x636   :  { %v2818_v53 = vcombine.high %v2794_v2, %v4223_v45  ;;  %v2819_v52 = vcombine.high %v2801_v49, %v4223_v45  ;;  %v2820_v10 = vcombine.high %v2810_v56, %v4223_v45  ;;  %v2821_v11 = vcombine.high %v2817_v6, %v4223_v45  ;;  %v2991_v45 = vld [vmem:[%s5038_s5 + $0x8] sm:$0xff] }
 0x637   :  { %v4067_v23 = vpack.c.bf16 %v2991_v45, %v2990_v60  ;;  %v4182_v45 = vld [vmem:[%s5033_s0 + $0x8] sm:$0x3] }
 0x638   :  { %v2830_v12 = vcombine.low %v2794_v2, %v2818_v53  ;;  %v2846_v13 = vcombine.low %v2801_v49, %v2819_v52  ;;  %v2898_v18 = vcombine.low %v2810_v56, %v2820_v10  ;;  %v2914_v14 = vcombine.low %v2817_v6, %v2821_v11 }
 0x639   :  { %4068 = vmatprep.subr.bf16.mxu1 %v4067_v23 }
 0x63a   :  { %v2905_v20 = vrot.slane %v2898_v18, %v4330_v17  ;;  %v2921_v21 = vrot.slane %v2914_v14, %v4330_v17  ;;  %v2837_v22 = vrot.slane %v2830_v12, %v4330_v17  ;;  %v2853_v7 = vrot.slane %v2846_v13, %v4330_v17  ;;  %4070 = vmatpush3.bf16.msra.mxu1 %v4067_v23  ;;  %v4184_v23 = vld [vmem:[%s5033_s0] sm:$0x3] }
 0x63c   :  { %v2922_v63 = vcombine.low %v2897_v15, %v2905_v20  ;;  %v2938_v46 = vcombine.low %v2913_v16, %v2921_v21  ;;  %v2854_v47 = vcombine.low %v2829_v19, %v2837_v22  ;;  %v2870_v1 = vcombine.low %v2845_v59, %v2853_v7 }
 0x63d   :  { %v2855_v24 = vcombine.high %v2829_v19, %v2837_v22  ;;  %v2871_v25 = vcombine.high %v2845_v59, %v2853_v7  ;;  %v2923_v26 = vcombine.high %v2897_v15, %v2905_v20  ;;  %v2939_v32 = vcombine.high %v2913_v16, %v2921_v21  ;;  %v4183_v21 = vld [vmem:[%s5033_s0 + $0xa] sm:$0x3] }
 0x63e   :  { %v2930_v36 = vrot.slane %v2922_v63, %v4504_v50  ;;  %v2946_v27 = vrot.slane %v2938_v46, %v4504_v50  ;;  %v2862_v34 = vrot.slane %v2854_v47, %v4504_v50  ;;  %v2878_v28 = vrot.slane %v2870_v1, %v4504_v50  ;;  %v4185_v46 = vld [vmem:[%s5033_s0 + $0x2] sm:$0x3]  ;;  %v4186_v1 = vld [vmem:[%s5033_s0 + $0xc] sm:$0x3] }
 0x63f   :  { %v2869_v35 = vrot.slane %v2855_v24, %v4504_v50  ;;  %v2885_v42 = vrot.slane %v2871_v25, %v4504_v50  ;;  %v2937_v37 = vrot.slane %v2923_v26, %v4504_v50  ;;  %v2953_v62 = vrot.slane %v2939_v32, %v4504_v50  ;;  %v4187_v25 = vld [vmem:[%s5033_s0 + $0xe] sm:$0x3] }
 0x640   :  { %v2955_v29 = vcombine.high %v2930_v36, %v2946_v27  ;;  %v2887_v30 = vcombine.high %v2862_v34, %v2878_v28  ;;  %v2954_v4 = vcombine.low %v2930_v36, %v2946_v27  ;;  %v2886_v5 = vcombine.low %v2862_v34, %v2878_v28  ;;  %v4188_v36 = vld [vmem:[%s5033_s0 + $0x4] sm:$0x3]  ;;  %v4189_v34 = vld [vmem:[%s5033_s0 + $0x6] sm:$0x3] }
 0x641   :  { %v2888_v31 = vcombine.low %v2869_v35, %v2885_v42  ;;  %v2889_v33 = vcombine.high %v2869_v35, %v2885_v42  ;;  %v2956_v48 = vcombine.low %v2937_v37, %v2953_v62  ;;  %v2957_v54 = vcombine.high %v2937_v37, %v2953_v62 }
 0x642   :  { %2962 = vrot.lane.b32.xlu1 %v2955_v29, %s4227_s30  ;;  %2960 = vrot.lane.b32.xlu0 %v2887_v30, %s4227_s30  ;;  %v4071_v50 = vpack.c.bf16 %v2993_v43, %v2992_v44 }
 0x644   :  { %4072 = vmatprep.subr.bf16.mxu1 %v4071_v50 }
 0x645   :  { %4074 = vmatpush3.bf16.msra.mxu1 %v4071_v50 }
 0x646   :  { %2968 = vrot.lane.b32.xlu1 %v2888_v31, %s4228_s14  ;;  %2976 = vrot.lane.b32.xlu0 %v2889_v33, %s4229_s15 }
 0x64a   :  { %2970 = vrot.lane.b32.xlu1 %v2956_v48, %s4228_s14 }
 0x64e   :  { %2978 = vrot.lane.b32.xlu1 %v2957_v54, %s4229_s15 }
 0x6b4   :  { %v2963_v55 = vpop.permute.xlu1 %2962  ;;  %v2961_v57 = vpop.permute.xlu0 %2960 }
 0x6b5   :  { %v2982_v58 = vsel %vm1405_vm2, %v2886_v5, %v2961_v57  ;;  %v2983_v6 = vsel %vm1405_vm2, %v2954_v4, %v2963_v55 }
 0x6b8   :  { %v2969_v0 = vpop.permute.xlu1 %2968  ;;  %v2977_v61 = vpop.permute.xlu0 %2976 }
 0x6b9   :  { %v2985_v2 = vsel %vm2984_vm3, %v2982_v58, %v2969_v0 }
 0x6ba   :  { %v2988_v49 = vsel %vm2987_vm4, %v2985_v2, %v2977_v61 }
 0x6bb   :  { %4010 = vmatprep.mubr.msk.f32.mxu1 %vm99_vm0, %v2988_v49 }
 0x6bc   :  { %v2971_v56 = vpop.permute.xlu1 %2970 }
 0x6bd   :  { %v2986_v3 = vsel %vm2984_vm3, %v2983_v6, %v2971_v56 }
 0x6c0   :  { %v2979_v8 = vpop.permute.xlu1 %2978 }
 0x6c1   :  { %v2989_v9 = vsel %vm2987_vm4, %v2986_v3, %v2979_v8 }
 0x6c2   :  { %4011 = vmatmul.mubr.msk.f32.vlgmr.msra.gmra.mrb[20].mxu1 %vm99_vm0, %v2989_v9 }
 0x795   :  { %v4012_v53 = vpop.f32.mrb[20].mxu1 }
 0x796   :  { %v3079_v52 = vadd.f32 %v4012_v53, %v3832_v51  ;;  %v3073_v10 = vpop.f32.mrb[21].mxu1 }
 0x797   :  { %v3074_v11 = vadd.f32 %v3832_v51, %v3073_v10 }
 0x798   :  { %v3101_v12 = vcombine.high %v3079_v52, %v3079_v52  ;;  %v3108_v13 = vrot.slane %v3079_v52, %v4330_v17 }
 0x799   :  { %v3084_v18 = vcombine.high %v3074_v11, %v3074_v11  ;;  %v3091_v14 = vrot.slane %v3074_v11, %v4330_v17 }
 0x79a   :  { %v3115_v15 = vrot.slane %v3101_v12, %v4330_v17  ;;  %v3116_v16 = vcombine.high %v3108_v13, %v3108_v13  ;;  %v4818_v20 = vadd.f32 %v4182_v45, %v3108_v13 }
 0x79b   :  { %v3098_v19 = vrot.slane %v3084_v18, %v4330_v17  ;;  %v3099_v59 = vcombine.high %v3091_v14, %v3091_v14  ;;  %v4828_v63 = vadd.f32 %v4184_v23, %v3091_v14 }
 0x79c   :  { %v3117_v60 = vcombine.high %v3115_v15, %v3115_v15  ;;  %v4823_v22 = vadd.f32 %v4183_v21, %v3116_v16  ;;  %v4838_v24 = vadd.f32 %v4186_v1, %v3115_v15 }
 0x79d   :  { %v3100_v7 = vcombine.high %v3098_v19, %v3098_v19  ;;  %v4833_v47 = vadd.f32 %v4185_v46, %v3099_v59  ;;  %v4850_v27 = vadd.f32 %v4188_v36, %v3098_v19 }
 0x79e   :  { %v4843_v26 = vadd.f32 %v4187_v25, %v3117_v60  ;;  %v3161_v32 = vcombine.low %v4818_v20, %v4823_v22 }
 0x79f   :  { %v4855_v28 = vadd.f32 %v4189_v34, %v3100_v7  ;;  %v3144_v35 = vcombine.low %v4828_v63, %v4833_v47 }
 0x7a0   :  { %v3162_v42 = vcombine.low %v4838_v24, %v4843_v26  ;;  %v3169_v62 = vrot.slane %v3161_v32, %v4330_v17 }
 0x7a1   :  { %v3145_v37 = vcombine.low %v4850_v27, %v4855_v28  ;;  %v3152_v43 = vrot.slane %v3144_v35, %v4330_v17  ;;  %v3468_v35 = vld [vmem:[%s5042_s9] sm:$0xff] }
 0x7a2   :  { %v3176_v44 = vrot.slane %v3162_v42, %v4330_v17  ;;  %v3469_v42 = vld [vmem:[%s5042_s9 + $0x8] sm:$0xff] }
 0x7a3   :  { %v3159_v29 = vrot.slane %v3145_v37, %v4330_v17  ;;  %v3470_v37 = vld [vmem:[%s5042_s9 + $0x10] sm:$0xff] }
 0x7a4   :  { %v3177_v30 = vcombine.low %v3169_v62, %v3176_v44  ;;  %v4075_v62 = vpack.c.bf16 %v3469_v42, %v3468_v35  ;;  %v3471_v44 = vld [vmem:[%s5042_s9 + $0x18] sm:$0xff] }
 0x7a5   :  { %v3160_v4 = vcombine.low %v3152_v43, %v3159_v29  ;;  %v4079_v43 = vpack.c.bf16 %v3471_v44, %v3470_v37 }
 0x7a6   :  { %v3183_v5 = vsel %vm99_vm0, %v3177_v30, 0.0  ;;  %4076 = vmatprep.subr.bf16.mxu1 %v4075_v62 }
 0x7a7   :  { %3184 = vadd.xlane.f32.xlu1 %v3183_v5  ;;  %v3180_v31 = vsel %vm99_vm0, %v3160_v4, 0.0  ;;  %4078 = vmatpush3.bf16.msra.mxu1 %v4075_v62 }
 0x7a8   :  { %3181 = vadd.xlane.f32.xlu0 %v3180_v31  ;;  %4080 = vmatprep.subr.bf16.mxu1 %v4079_v43 }
 0x7ab   :  { %4082 = vmatpush3.bf16.msra.mxu1 %v4079_v43 }
 0x834   :  { %v3185_v33 = vpop.xlane.xlu1 %3184 }
 0x835   :  { %v3187_v48 = vmul.f32 0.03125, %v3185_v33  ;;  %v3182_v54 = vpop.xlane.xlu0 %3181  ;;  %v3835_v33 = vld [vmem:[%s5040_s7] ss:$0 sm:$0xff] }
 0x836   :  { %v3186_v50 = vmul.f32 0.03125, %v3182_v54  ;;  %v3836_v54 = vld [vmem:[%s5041_s8] ss:$0 sm:$0xff] }
 0x837   :  { %v3224_v55 = vrot.slane %v3187_v48, %v4339_v38  ;;  %v3231_v57 = vrot.slane %v3187_v48, %v4342_v39  ;;  %v3238_v58 = vrot.slane %v3187_v48, %v4345_v40  ;;  %v3245_v0 = vrot.slane %v3187_v48, %v4348_v41 }
 0x838   :  { %v3196_v61 = vrot.slane %v3186_v50, %v4339_v38  ;;  %v3203_v2 = vrot.slane %v3186_v50, %v4342_v39  ;;  %v3210_v49 = vrot.slane %v3186_v50, %v4345_v40  ;;  %v3217_v56 = vrot.slane %v3186_v50, %v4348_v41 }
 0x839   :  { %v4878_v6 = vsub.f32 %v4818_v20, %v3224_v55  ;;  %v4881_v3 = vsub.f32 %v4823_v22, %v3231_v57  ;;  %v4884_v8 = vsub.f32 %v4838_v24, %v3238_v58  ;;  %v4887_v9 = vsub.f32 %v4843_v26, %v3245_v0 }
 0x83a   :  { %v3254_v51 = vsub.f32 %v4828_v63, %v3196_v61  ;;  %v3255_v53 = vsub.f32 %v4833_v47, %v3203_v2  ;;  %v3256_v52 = vsub.f32 %v4850_v27, %v3210_v49  ;;  %v3257_v10 = vsub.f32 %v4855_v28, %v3217_v56 }
 0x83b   :  { %v3266_v11 = vmul.f32 %v4878_v6, %v4878_v6  ;;  %v3267_v12 = vmul.f32 %v4881_v3, %v4881_v3  ;;  %v3268_v13 = vmul.f32 %v4884_v8, %v4884_v8  ;;  %v3269_v18 = vmul.f32 %v4887_v9, %v4887_v9 }
 0x83c   :  { %v3262_v14 = vmul.f32 %v3254_v51, %v3254_v51  ;;  %v3263_v15 = vmul.f32 %v3255_v53, %v3255_v53  ;;  %v3264_v16 = vmul.f32 %v3256_v52, %v3256_v52  ;;  %v3265_v19 = vmul.f32 %v3257_v10, %v3257_v10 }
 0x83d   :  { %v3295_v59 = vcombine.low %v3266_v11, %v3267_v12  ;;  %v3296_v60 = vcombine.low %v3268_v13, %v3269_v18  ;;  %v3405_v50 = vcombine.high %v3835_v33, %v3835_v33  ;;  %v3412_v55 = vrot.slane %v3835_v33, %v4330_v17 }
 0x83e   :  { %v3278_v45 = vcombine.low %v3262_v14, %v3263_v15  ;;  %v3279_v21 = vcombine.low %v3264_v16, %v3265_v19  ;;  %v3439_v57 = vcombine.high %v3836_v54, %v3836_v54  ;;  %v3446_v0 = vrot.slane %v3836_v54, %v4330_v17  ;;  %v3616_v54 = vld [vmem:[%s5044_s11] sm:$0xff] }
 0x83f   :  { %v3303_v46 = vrot.slane %v3295_v59, %v4330_v17  ;;  %v3310_v1 = vrot.slane %v3296_v60, %v4330_v17  ;;  %v3419_v58 = vrot.slane %v3405_v50, %v4330_v17  ;;  %v3420_v2 = vcombine.high %v3412_v55, %v3412_v55  ;;  %v3617_v50 = vld [vmem:[%s5044_s11 + $0x8] sm:$0xff] }
 0x840   :  { %v3286_v7 = vrot.slane %v3278_v45, %v4330_v17  ;;  %v3293_v23 = vrot.slane %v3279_v21, %v4330_v17  ;;  %v3453_v49 = vrot.slane %v3439_v57, %v4330_v17  ;;  %v3454_v14 = vcombine.high %v3446_v0, %v3446_v0  ;;  %v3618_v57 = vld [vmem:[%s5044_s11 + $0x10] sm:$0xff] }
 0x841   :  { %v3311_v36 = vcombine.low %v3303_v46, %v3310_v1  ;;  %v3421_v18 = vcombine.high %v3419_v58, %v3419_v58 }
 0x842   :  { %v3294_v25 = vcombine.low %v3286_v7, %v3293_v23  ;;  %v3455_v45 = vcombine.high %v3453_v49, %v3453_v49 }
 0x843   :  { %v3317_v34 = vsel %vm99_vm0, %v3311_v36, 0.0 }
 0x844   :  { %v3314_v32 = vsel %vm99_vm0, %v3294_v25, 0.0 }
 0x845   :  { %3315 = vadd.xlane.f32.xlu0 %v3314_v32 }
 0x849   :  { %3318 = vadd.xlane.f32.xlu0 %v3317_v34 }
 0x8d2   :  { %v3316_v29 = vpop.xlane.xlu0 %3315 }
 0x8d3   :  { %v3320_v30 = vmul.f32 0.03125, %v3316_v29 }
 0x8d5   :  { %v3322_v4 = vadd.f32 1e-05, %v3320_v30 }
 0x8d6   :  { %v3319_v5 = vpop.xlane.xlu0 %3318 }
 0x8d7   :  { %4170 = vrsqrt.f32 %v3322_v4  ;;  %v3321_v31 = vmul.f32 0.03125, %v3319_v5 }
 0x8d9   :  { %v3323_v48 = vadd.f32 1e-05, %v3321_v31 }
 0x8db   :  { %4172 = vrsqrt.f32 %v3323_v48 }
 0x8e1   :  { %v4171_v61 = vpop.eup %4170 }
 0x8e2   :  { %v3334_v56 = vrot.slane %v4171_v61, %v4339_v38  ;;  %v3341_v11 = vrot.slane %v4171_v61, %v4342_v39  ;;  %v3348_v12 = vrot.slane %v4171_v61, %v4345_v40  ;;  %v3355_v13 = vrot.slane %v4171_v61, %v4348_v41  ;;  %v3620_v61 = vld [vmem:[%s5044_s11 + $0x20] sm:$0xff] }
 0x8e4   :  { %v3392_v15 = vmul.f32 %v3334_v56, %v3254_v51  ;;  %v3393_v16 = vmul.f32 %v3341_v11, %v3255_v53  ;;  %v3394_v19 = vmul.f32 %v3348_v12, %v3256_v52  ;;  %v3395_v59 = vmul.f32 %v3355_v13, %v3257_v10  ;;  %v3622_v56 = vld [vmem:[%s5044_s11 + $0x30] sm:$0xff]  ;;  %v3623_v11 = vld [vmem:[%s5044_s11 + $0x38] sm:$0xff]  ;;  %v3624_v13 = vld [vmem:[%s5044_s11 + $0x40] sm:$0xff] }
 0x8e5   :  { %v4173_v60 = vpop.eup %4172  ;;  %v4095_v12 = vpack.c.bf16 %v3623_v11, %v3622_v56 }
 0x8e6   :  { %v3369_v21 = vrot.slane %v4173_v60, %v4342_v39  ;;  %v3383_v7 = vrot.slane %v4173_v60, %v4348_v41  ;;  %v3426_v23 = vmul.f32 %v3412_v55, %v3392_v15  ;;  %v3427_v46 = vmul.f32 %v3420_v2, %v3393_v16  ;;  %v3626_v15 = vld [vmem:[%s5044_s11 + $0x50] sm:$0xff]  ;;  %v3627_v16 = vld [vmem:[%s5044_s11 + $0x58] sm:$0xff] }
 0x8e7   :  { %v3428_v1 = vmul.f32 %v3419_v58, %v3394_v19  ;;  %v3429_v25 = vmul.f32 %v3421_v18, %v3395_v59  ;;  %v3362_v32 = vrot.slane %v4173_v60, %v4339_v38  ;;  %v3376_v36 = vrot.slane %v4173_v60, %v4345_v40  ;;  %v3628_v59 = vld [vmem:[%s5044_s11 + $0x60] sm:$0xff]  ;;  %v3629_v60 = vld [vmem:[%s5044_s11 + $0x68] sm:$0xff] }
 0x8e8   :  { %v3397_v34 = vmul.f32 %v3369_v21, %v4881_v3  ;;  %v3399_v51 = vmul.f32 %v3383_v7, %v4887_v9  ;;  %v3460_v53 = vadd.f32 %v3446_v0, %v3426_v23  ;;  %v3461_v52 = vadd.f32 %v3454_v14, %v3427_v46  ;;  %v3630_v21 = vld [vmem:[%s5044_s11 + $0x70] sm:$0xff]  ;;  %v3631_v7 = vld [vmem:[%s5044_s11 + $0x78] sm:$0xff]  ;;  %v3837_v46 = vld [vmem:[%s5043_s10] ss:$0 sm:$0xff] }
 0x8e9   :  { %v3462_v10 = vadd.f32 %v3453_v49, %v3428_v1  ;;  %v3463_v35 = vadd.f32 %v3455_v45, %v3429_v25  ;;  %v3396_v39 = vmul.f32 %v3362_v32, %v4878_v6  ;;  %v3398_v41 = vmul.f32 %v3376_v36, %v4884_v8 }
 0x8ea   :  { %v3431_v42 = vmul.f32 %v3420_v2, %v3397_v34  ;;  %v3433_v37 = vmul.f32 %v3421_v18, %v3399_v51  ;;  %v3487_v62 = vcombine.low %v3460_v53, %v3461_v52  ;;  %v3621_v2 = vld [vmem:[%s5044_s11 + $0x28] sm:$0xff]  ;;  %v4103_v19 = vpack.c.bf16 %v3627_v16, %v3626_v15 }
 0x8eb   :  { %v3488_v44 = vcombine.low %v3462_v10, %v3463_v35  ;;  %v3430_v43 = vmul.f32 %v3412_v55, %v3396_v39  ;;  %v3432_v38 = vmul.f32 %v3419_v58, %v3398_v41  ;;  %v4083_v55 = vpack.c.bf16 %v3617_v50, %v3616_v54  ;;  %v3619_v58 = vld [vmem:[%s5044_s11 + $0x18] sm:$0xff]  ;;  %v3625_v18 = vld [vmem:[%s5044_s11 + $0x48] sm:$0xff] }
 0x8ec   :  { %v3465_v29 = vadd.f32 %v3454_v14, %v3431_v42  ;;  %v3467_v40 = vadd.f32 %v3455_v45, %v3433_v37  ;;  %v3495_v3 = vrot.slane %v3487_v62, %v4330_v17  ;;  %v4099_v14 = vpack.c.bf16 %v3625_v18, %v3624_v13 }
 0x8ed   :  { %v3502_v9 = vrot.slane %v3488_v44, %v4330_v17  ;;  %v3464_v30 = vadd.f32 %v3446_v0, %v3430_v43  ;;  %v3466_v4 = vadd.f32 %v3453_v49, %v3432_v38  ;;  %4084 = vmatprep.subr.bf16.mxu0 %v4083_v55  ;;  %v4087_v0 = vpack.c.bf16 %v3619_v58, %v3618_v57  ;;  %v3842_v43 = vld [vmem:[%s5045_s12] ss:$0 sm:$0xff]  ;;  %s4230_s12 = smov [#allocation2]  }
 0x8ee   :  { %4086 = vmatpush3.bf16.msra.mxu0 %v4083_v55  ;;  %v4091_v49 = vpack.c.bf16 %v3621_v2, %v3620_v61  ;;  %v4107_v45 = vpack.c.bf16 %v3629_v60, %v3628_v59  ;;  %v4111_v23 = vpack.c.bf16 %v3631_v7, %v3630_v21  ;;  %s3780_s4 = sshll.u32 %s4230_s12, 4  ;;  %s3781_s4 = int_to_ptr.vmem [resolvable:$true] %s3780_s4 }
 0x8ef   :  { %v3503_v5 = vcombine.low %v3495_v3, %v3502_v9  ;;  %v3504_v31 = vcombine.low %v3464_v30, %v3465_v29  ;;  %v3505_v33 = vcombine.low %v3466_v4, %v3467_v40  ;;  %4088 = vmatprep.subr.bf16.mxu0 %v4087_v0  ;;  %s4190_s21 = scalar_lea.vmem %s3781_s4, 256  ;;  %p4195_p1 = scmp.lt.s32.totalorder %s3781_s4, %s3781_s4 }
 0x8f0   :  { %p4191_p0 = scmp.ne.s32.totalorder %s3781_s4, %s4190_s21  ;;  %p4196_p2 = scmp.lt.s32.totalorder %s4190_s21, %s4190_s21 }
 0x8f1   :  { %4021 = vmatprep.mubr.msk.f32.mxu1 %vm99_vm0, %v3503_v5  ;;  %v3512_v6 = vrot.slane %v3504_v31, %v4330_v17  ;;  %v3519_v8 = vrot.slane %v3505_v33, %v4330_v17 }
 0x8f2   :  { %4090 = vmatpush3.bf16.msra.mxu0 %v4087_v0  ;;  %p4197_p3 = por %p4196_p2, %p4195_p1 }
 0x8f3   :  { %v3520_v48 = vcombine.low %v3512_v6, %v3519_v8  ;;  %4092 = vmatprep.subr.bf16.mxu0 %v4091_v49 }
 0x8f4   :  { %p4198_p4 = pnand %p4197_p3, %p4191_p0 }
 0x8f5   :  { %4022 = vmatmul.mubr.msk.f32.vlgmr.msra.gmra.mrb[22].mxu1 %vm99_vm0, %v3520_v48 }
 0x8f6   :  { %4094 = vmatpush3.bf16.msra.mxu0 %v4091_v49 }
 0x8f7   :  { %4096 = vmatprep.subr.bf16.mxu0 %v4095_v12 }
 0x8fa   :  { %4098 = vmatpush3.bf16.msra.mxu0 %v4095_v12 }
 0x8fb   :  { %4100 = vmatprep.subr.bf16.mxu0 %v4099_v14 }
 0x8fe   :  { %4102 = vmatpush3.bf16.msra.mxu0 %v4099_v14 }
 0x8ff   :  { %4104 = vmatprep.subr.bf16.mxu0 %v4103_v19 }
 0x902   :  { %4106 = vmatpush3.bf16.msra.mxu0 %v4103_v19 }
 0x903   :  { %4108 = vmatprep.subr.bf16.mxu0 %v4107_v45 }
 0x906   :  { %4110 = vmatpush3.bf16.msra.mxu0 %v4107_v45 }
 0x907   :  { %4112 = vmatprep.subr.bf16.mxu0 %v4111_v23 }
 0x90a   :  { %4114 = vmatpush3.bf16.msra.mxu0 %v4111_v23 }
 0x9c8   :  { %v4023_v1 = vpop.f32.mrb[22].mxu1 }
 0x9c9   :  { %v3597_v25 = vadd.f32 %v4023_v1, %v3837_v46  ;;  %v3591_v32 = vpop.f32.mrb[23].mxu1 }
 0x9ca   :  { %v3592_v36 = vadd.f32 %v3837_v46, %v3591_v32 }
 0x9cb   :  { %v3841_v34 = vmul.f32 -1.702, %v3597_v25 }
 0x9cc   :  { %v3840_v51 = vmul.f32 -1.702, %v3592_v36 }
 0x9cd   :  { %v3606_v53 = vmul.f32 1.442695, %v3841_v34 }
 0x9ce   :  { %v3604_v52 = vmul.f32 1.442695, %v3840_v51 }
 0x9cf   :  { %4174 = vpow2.f32 %v3606_v53 }
 0x9d0   :  { %4176 = vpow2.f32 %v3604_v52 }
 0x9d9   :  { %v4175_v10 = vpop.eup %4174 }
 0x9da   :  { %v4177_v35 = vpop.eup %4176  ;;  %v3609_v39 = vadd.f32 1.0, %v4175_v10 }
 0x9db   :  { %v3608_v41 = vadd.f32 1.0, %v4177_v35 }
 0x9dc   :  { %4178 = vrcp.f32 %v3609_v39 }
 0x9dd   :  { %4180 = vrcp.f32 %v3608_v41 }
 0x9e6   :  { %v4179_v42 = vpop.eup %4178 }
 0x9e7   :  { %v4181_v37 = vpop.eup %4180  ;;  %v3615_v44 = vmul.f32 %v4179_v42, %v3597_v25 }
 0x9e8   :  { %v3614_v62 = vmul.f32 %v4181_v37, %v3592_v36 }
 0x9ea   :  { %4056 = vmatprep.mubr.f32.mxu0 %v3614_v62 }
 0x9eb   :  { %4057 = vmatmul.mubr.f32.vlgmr.msra.gmra.mrb[14].mxu0 %v3615_v44 }
 0xabe   :  { %v4058_v38 = vpop.f32.mrb[14].mxu0 }
 0xabf   :  { %v3711_v29 = vadd.f32 %v4058_v38, %v3842_v43  ;;  %v3705_v40 = vpop.f32.mrb[15].mxu0 }
 0xac0   :  { %v3706_v3 = vadd.f32 %v3842_v43, %v3705_v40 }
 0xac1   :  { %v3733_v9 = vcombine.high %v3711_v29, %v3711_v29  ;;  %v3740_v30 = vrot.slane %v3711_v29, %v4330_v17 }
 0xac2   :  { %v3716_v4 = vcombine.high %v3706_v3, %v3706_v3  ;;  %v3723_v5 = vrot.slane %v3706_v3, %v4330_v17 }
 0xac3   :  { %v3747_v31 = vrot.slane %v3733_v9, %v4330_v17  ;;  %v3748_v33 = vcombine.high %v3740_v30, %v3740_v30  ;;  %v3762_v6 = vadd.f32 %v3740_v30, %v4818_v20 }
 0xac4   :  { %v3730_v8 = vrot.slane %v3716_v4, %v4330_v17  ;;  %v3731_v48 = vcombine.high %v3723_v5, %v3723_v5  ;;  %v3758_v54 = vadd.f32 %v3723_v5, %v4828_v63 }
 0xac5   :  { %v3749_v50 = vcombine.high %v3747_v31, %v3747_v31  ;;  %v3763_v55 = vadd.f32 %v3748_v33, %v4823_v22  ;;  %v3764_v57 = vadd.f32 %v3747_v31, %v4838_v24  ;;  %3771 = vst.msk [vmem:[#allocation2 + $0x8] sm:$0x3] %vm3766_vm5, %v3762_v6 }
 0xac6   :  { %v3732_v58 = vcombine.high %v3730_v8, %v3730_v8  ;;  %v3759_v0 = vadd.f32 %v3731_v48, %v4833_v47  ;;  %v3760_v61 = vadd.f32 %v3730_v8, %v4850_v27  ;;  %3767 = vst.msk [vmem:[#allocation2] sm:$0x3] %vm3766_vm5, %v3758_v54 }
 0xac7   :  { %v3765_v17 = vadd.f32 %v3749_v50, %v4843_v26  ;;  %3772 = vst.msk [vmem:[#allocation2 + $0xa] sm:$0x3] %vm3766_vm5, %v3763_v55  ;;  %3773 = vst.msk [vmem:[#allocation2 + $0xc] sm:$0x3] %vm3766_vm5, %v3764_v57 }
 0xac8   :  { %v3761_v20 = vadd.f32 %v3732_v58, %v4855_v28  ;;  %3768 = vst.msk [vmem:[#allocation2 + $0x2] sm:$0x3] %vm3766_vm5, %v3759_v0  ;;  %3769 = vst.msk [vmem:[#allocation2 + $0x4] sm:$0x3] %vm3766_vm5, %v3760_v61 }
 0xac9   :  { %3774 = vst.msk [vmem:[#allocation2 + $0xe] sm:$0x3] %vm3766_vm5, %v3765_v17 }
 0xaca   :  { %3770 = vst.msk [vmem:[#allocation2 + $0x6] sm:$0x3] %vm3766_vm5, %v3761_v20 }
 0xacb   :  { %4201 = shalt.err (!%p4198_p4)
}
 0xacc   :  { %s4202_s24 = scalar_lea.hbm %s5046_s13, 256 }
 0xacd   :  { %p4203_p5 = scmp.ne.s32.totalorder %s5046_s13, %s4202_s24  ;;  %p4206_p6 = scmp.lt.u32.totalorder %s4202_s24, %s5046_s13 }
 0xacf   :  { %p4208_p7 = pnand %p4206_p6, %p4203_p5 }
 0xad1   :  { %4211 = shalt.err (!%p4208_p7)
}
 0xad2   :  { %s4231_s28 = smov 32   ;;  %s4232_s29 = smov 2  }
 0xad3   :  { %3786 = dma.vmem_to_hbm [thread:$0]  %s3781_s4, 256, %s5046_s13, [#allocation3], %s4231_s28, %s4231_s28, %s4232_s29  }
 0xad4   :  { %4212 = dma.done.wait [#allocation3], 256  }
 0xad5   :  { %4213 = vsyncadd [#allocation3], 4294967040 }
 0xad6   :  { %3790 = vsyncpa [#allocation3], 1 }

</bundles_post_ra>
